<compile_context>
chip_gen: v6e
topology: v6e:2x2x1
jax: 0.10.0
libtpu: 0.0.40
codegen_flags: <defaults>
</compile_context>

<pallas_src>
import numpy as np
import jax
import jax.numpy as jnp
from jax.experimental import pallas as pl
from jax.experimental.pallas import tpu as pltpu

LEAKY_SLOPE = 0.2
BN_EPS = 1e-5
K, S, P = 4, 2, 1          # every DCGAN conv: kernel 4, stride 2, padding 1
TAPS = K * K               # 16 taps per conv
HIGHEST = jax.lax.Precision.HIGHEST


def _round_up(x, m):
    return (x + m - 1) // m * m


# --------------------------------------------------------------------------
# In-kernel helpers (traced inside the fused Pallas kernel)
# --------------------------------------------------------------------------
def _leaky(x):
    return jnp.where(x > 0, x, LEAKY_SLOPE * x)


def _batchnorm(y, n_rows, gamma, beta):
    """PyTorch training-mode BN: per-channel batch mean / biased variance.

    Two-pass statistics (mean, then centered second moment) over the first
    `n_rows` rows (any padded rows beyond n_rows are excluded from the stats).
    """
    yr = y[:n_rows, :] if n_rows < y.shape[0] else y
    mean = jnp.mean(yr, axis=0, keepdims=True)
    var = jnp.mean((yr - mean) ** 2, axis=0, keepdims=True)
    return (y - mean) * jax.lax.rsqrt(var + BN_EPS) * gamma + beta


# --------------------------------------------------------------------------
# Plain-JAX / numpy glue: layer-0 im2col, dense weight packing, gather mats
# --------------------------------------------------------------------------
def _im2col(x_nhwc):
    """(N,H,W,C) -> (N*Ho*Wo, TAPS*C) patches for the k=4,s=2,p=1 conv."""
    N, H, W, C = x_nhwc.shape
    xp = jnp.pad(x_nhwc, ((0, 0), (P, P), (P, P), (0, 0)))
    Ho = (H + 2 * P - K) // S + 1
    Wo = (W + 2 * P - K) // S + 1
    cols = []
    for kh in range(K):
        for kw in range(K):
            cols.append(xp[:, kh:kh + S * Ho:S, kw:kw + S * Wo:S, :])
    pat = jnp.stack(cols, axis=3)                     # (N, Ho, Wo, TAPS, C)
    return pat.reshape(N * Ho * Wo, TAPS * C), Ho, Wo


def _pack_weight(w_oihw, cout_pad):
    """(Cout,Cin,KH,KW) -> dense bf16 (TAPS*Cin, cout_pad), row = t*Cin + ci."""
    cout, cin, kh, kw = w_oihw.shape
    wp = jnp.transpose(w_oihw, (2, 3, 1, 0)).reshape(kh * kw * cin, cout)
    if cout_pad > cout:
        wp = jnp.pad(wp, ((0, 0), (0, cout_pad - cout)))
    return wp.astype(jnp.bfloat16)


def _gather_matrix(n, h, w, n_cols):
    """bf16 (TAPS*ro_pad, n_cols) 0/1 gather matrix for the k=4,s=2,p=1 conv.

    Row t*ro_pad + o selects the flat (n,ih,iw) input row feeding output
    position o = flat (n,oh,ow) at tap t = kh*K+kw.  All-zero rows encode the
    conv's zero padding and the padding of the output row count up to a
    multiple of 8 (sublane alignment for the in-kernel tap relayout).
    """
    ho = (h + 2 * P - K) // S + 1
    wo = (w + 2 * P - K) // S + 1
    ro = n * ho * wo
    ro_pad = _round_up(ro, 8)
    sel = np.zeros((TAPS, ro_pad, n_cols), np.float32)
    for kh in range(K):
        for kw in range(K):
            t = kh * K + kw
            for b in range(n):
                for oh in range(ho):
                    ih = S * oh + kh - P
                    if not (0 <= ih < h):
                        continue
                    for ow in range(wo):
                        iw = S * ow + kw - P
                        if 0 <= iw < w:
                            sel[t, b * ho * wo + oh * wo + ow,
                                b * h * w + ih * w + iw] = 1.0
    return (jnp.asarray(sel.reshape(TAPS * ro_pad, n_cols), jnp.bfloat16),
            ho, wo, ro, ro_pad)


def make_params(hidden_dim, nc=1, seed=0):
    """Deterministic DCGAN-style weight init (normal, std=0.02)."""
    key = jax.random.PRNGKey(seed)
    shapes = [
        (hidden_dim, nc, K, K),
        (hidden_dim * 2, hidden_dim, K, K),
        (hidden_dim * 4, hidden_dim * 2, K, K),
        (1, hidden_dim * 4, K, K),
    ]
    keys = jax.random.split(key, len(shapes))
    weights = [0.02 * jax.random.normal(k, s, jnp.float32)
               for k, s in zip(keys, shapes)]
    # BatchNorm affine params at PyTorch defaults (gamma=1, beta=0)
    bn = {
        1: (jnp.ones((hidden_dim * 2,), jnp.float32),
            jnp.zeros((hidden_dim * 2,), jnp.float32)),
        2: (jnp.ones((hidden_dim * 4,), jnp.float32),
            jnp.zeros((hidden_dim * 4,), jnp.float32)),
    }
    return weights, bn


# --------------------------------------------------------------------------
# Fused forward: 4x (conv as 2 GEMMs) + BN + activations in ONE pallas_call
# --------------------------------------------------------------------------
def dcgan_critic_forward(x_nchw, weights, bn):
    """Pallas implementation of DCGANCritic.forward (input NCHW like PyTorch)."""
    w0, w1, w2, w3 = weights
    N, nc, H, W = x_nchw.shape
    c0, c1, c2, c3 = w0.shape[0], w1.shape[0], w2.shape[0], w3.shape[0]
    # channel counts must be sublane multiples for the dense tap relayout
    assert c0 % 8 == 0 and c1 % 8 == 0 and c2 % 8 == 0
    c3p = _round_up(c3, 8)

    x = jnp.transpose(x_nchw, (0, 2, 3, 1)).astype(jnp.float32)   # NCHW -> NHWC

    # layer-0 im2col on the tiny raw input feeds the fused kernel directly
    p0, ho0, wo0 = _im2col(x)                         # (N*ho0*wo0, TAPS*nc) f32
    rows0 = N * ho0 * wo0

    # concatenated bf16 gather matrices (stride-2 + zero padding) for layers 1-3
    s1, ho1, wo1, ro1, ro1p = _gather_matrix(N, ho0, wo0, rows0)
    s2, ho2, wo2, ro2, ro2p = _gather_matrix(N, ho1, wo1, ro1p)
    s3, ho3, wo3, ro3, ro3p = _gather_matrix(N, ho2, wo2, ro2p)

    # densely packed bf16 weights: (TAPS*Cin, Cout) -> dense K GEMMs
    w0p = _pack_weight(w0, c0)      # (TAPS*nc,  c0)
    w1p = _pack_weight(w1, c1)      # (TAPS*c0,  c1)   K = 128 @ hidden_dim=8
    w2p = _pack_weight(w2, c2)      # (TAPS*c1,  c2)   K = 256
    w3p = _pack_weight(w3, c3p)     # (TAPS*c2,  c3p)  K = 512

    g1 = bn[1][0].reshape(1, c1).astype(jnp.float32)
    b1 = bn[1][1].reshape(1, c1).astype(jnp.float32)
    g2 = bn[2][0].reshape(1, c2).astype(jnp.float32)
    b2 = bn[2][1].reshape(1, c2).astype(jnp.float32)

    def kernel(p0_ref, w0_ref, s1_ref, w1_ref, g1_ref, b1_ref,
               s2_ref, w2_ref, g2_ref, b2_ref, s3_ref, w3_ref,
               o_ref, p1_s, p2_s, p3_s):
        bf = jnp.bfloat16
        f32 = jnp.float32

        # ---- layer 0: dense-K GEMM (im2col done in wrapper) + LeakyReLU ----
        y = jnp.dot(p0_ref[...].astype(bf), w0_ref[...],
                    preferred_element_type=f32)              # (rows0, c0)
        y = _leaky(y)

        # ---- conv layer = gather GEMM -> tap relayout -> dense-K GEMM ------
        def conv(y_in, s_ref, p_ref, w_ref, cin, ro_pad):
            # 0/1 bf16 selector gathers stride-2 + zero-padded rows (1 GEMM)
            g = jnp.dot(s_ref[...], y_in.astype(bf),
                        preferred_element_type=f32)          # (TAPS*ro_pad, cin)
            # move taps into the contraction dim: 16 static narrow stores
            # (store/VPU slots, no MXU work, no serial accumulator chain)
            for t in range(TAPS):
                p_ref[:, t * cin:(t + 1) * cin] = \
                    g[t * ro_pad:(t + 1) * ro_pad, :]
            # single dense-K weight GEMM, K = TAPS*cin (128 / 256 / 512)
            return jnp.dot(p_ref[...].astype(bf), w_ref[...],
                           preferred_element_type=f32)       # (ro_pad, cout)

        # layer 1: conv + BatchNorm + LeakyReLU
        y = conv(y, s1_ref, p1_s, w1_ref, c0, ro1p)
        y = _leaky(_batchnorm(y, ro1, g1_ref[...], b1_ref[...]))
        # layer 2: conv + BatchNorm + LeakyReLU
        y = conv(y, s2_ref, p2_s, w2_ref, c1, ro2p)
        y = _leaky(_batchnorm(y, ro2, g2_ref[...], b2_ref[...]))
        # layer 3: conv + Sigmoid
        y = conv(y, s3_ref, p3_s, w3_ref, c2, ro3p)
        o_ref[...] = jax.nn.sigmoid(y).astype(o_ref.dtype)

    inputs = (p0, w0p, s1, w1p, g1, b1, s2, w2p, g2, b2, s3, w3p)

    def _spec(arr):
        zeros = (0,) * arr.ndim
        return pl.BlockSpec(arr.shape, lambda i, z=zeros: z)

    scratch_shapes = [
        pltpu.VMEM((ro1p, TAPS * c0), jnp.float32),
        pltpu.VMEM((ro2p, TAPS * c1), jnp.float32),
        pltpu.VMEM((ro3p, TAPS * c2), jnp.float32),
    ]

    # advisory cost estimate for XLA scheduling around the fused call
    def mm_flops(m, k, n):
        return 2 * m * k * n
    flops = mm_flops(rows0, TAPS * nc, c0)
    for (rop, rin, cin, cout) in ((ro1p, rows0, c0, c1),
                                  (ro2p, ro1p, c1, c2),
                                  (ro3p, ro2p, c2, c3p)):
        flops += mm_flops(TAPS * rop, rin, cin)    # gather GEMM
        flops += mm_flops(rop, TAPS * cin, cout)   # dense-K weight GEMM

    in_bytes = int(sum(int(np.prod(a.shape)) * a.dtype.itemsize for a in inputs))
    out_bytes = ro3p * c3p * 4
    scratch_bytes = 4 * (ro1p * TAPS * c0 + ro2p * TAPS * c1 + ro3p * TAPS * c2)
    # double-buffered inputs/output + scratch + 2 MiB headroom for intermediates
    vmem_limit = int(2 * (in_bytes + out_bytes) + scratch_bytes + (2 << 20))

    out = pl.pallas_call(
        kernel,
        out_shape=jax.ShapeDtypeStruct((ro3p, c3p), jnp.float32),
        grid=(1,),
        in_specs=[_spec(a) for a in inputs],
        out_specs=pl.BlockSpec((ro3p, c3p), lambda i: (0, 0)),
        scratch_shapes=scratch_shapes,
        compiler_params=pltpu.CompilerParams(
            dimension_semantics=("arbitrary",),
            vmem_limit_bytes=vmem_limit,
        ),
        cost_estimate=pl.CostEstimate(
            flops=int(flops),
            transcendentals=int(c1 + c2 + ro3p * c3p),
            bytes_accessed=int(in_bytes + out_bytes)),
    )(*inputs)

    # final conv has Cout=1; real rows are the first ro3 = N*ho3*wo3 rows in
    # (n, oh, ow) row-major order -> matches .view(-1, 1).squeeze(1)
    return out[:ro3, 0]


# --------------------------------------------------------------------------
# Pure-JAX reference (for correctness check)
# --------------------------------------------------------------------------
def _reference_forward(x_nchw, weights, bn):
    x = jnp.transpose(x_nchw, (0, 2, 3, 1)).astype(jnp.float32)
    modes = ["lrelu", "bn_lrelu", "bn_lrelu", "sigmoid"]
    for li, (w, mode) in enumerate(zip(weights, modes)):
        w_hwio = jnp.transpose(w, (2, 3, 1, 0))
        y = jax.lax.conv_general_dilated(
            x, w_hwio, window_strides=(S, S), padding=[(P, P), (P, P)],
            dimension_numbers=("NHWC", "HWIO", "NHWC"),
            precision=HIGHEST)
        if mode == "bn_lrelu":
            gamma, beta = bn[li]
            mean = jnp.mean(y, axis=(0, 1, 2), keepdims=True)
            var = jnp.mean((y - mean) ** 2, axis=(0, 1, 2), keepdims=True)
            y = (y - mean) * jax.lax.rsqrt(var + BN_EPS)
            y = y * gamma.reshape(1, 1, 1, -1) + beta.reshape(1, 1, 1, -1)
            y = jnp.where(y > 0, y, LEAKY_SLOPE * y)
        elif mode == "lrelu":
            y = jnp.where(y > 0, y, LEAKY_SLOPE * y)
        else:
            y = jax.nn.sigmoid(y)
        x = y
    return x.reshape(-1)


if __name__ == "__main__":
    hidden_dim, nc = 8, 1
    N, H, W = 2, 16, 16  # 16 -> 8 -> 4 -> 2 -> 1 spatial

    key = jax.random.PRNGKey(0)
    x = jax.random.normal(key, (N, nc, H, W), jnp.float32)  # PyTorch-style NCHW

    weights, bn = make_params(hidden_dim, nc=nc, seed=0)

    out = jax.block_until_ready(jax.jit(dcgan_critic_forward)(x, weights, bn))
    ref = jax.block_until_ready(_reference_forward(x, weights, bn))

    assert out.shape == (N,), out.shape
    # kernel uses bf16 MXU operands (f32 accumulate); compare vs f32 reference
    # with a correspondingly loosened tolerance on the sigmoid outputs.
    assert jnp.allclose(out, ref, rtol=5e-2, atol=3e-2), (out, ref)

    print("KERNEL_OK")
</pallas_src>

<mosaic_0001>
module attributes {stable_mosaic.version = 11 : i64} {
  func.func @kernel(%arg0: i32, %arg1: memref<128x16xf32, #tpu.memory_space<vmem>>, %arg2: memref<16x8xbf16, #tpu.memory_space<vmem>>, %arg3: memref<512x128xbf16, #tpu.memory_space<vmem>>, %arg4: memref<128x16xbf16, #tpu.memory_space<vmem>>, %arg5: memref<1x16xf32, #tpu.memory_space<vmem>>, %arg6: memref<1x16xf32, #tpu.memory_space<vmem>>, %arg7: memref<128x32xbf16, #tpu.memory_space<vmem>>, %arg8: memref<256x32xbf16, #tpu.memory_space<vmem>>, %arg9: memref<1x32xf32, #tpu.memory_space<vmem>>, %arg10: memref<1x32xf32, #tpu.memory_space<vmem>>, %arg11: memref<128x8xbf16, #tpu.memory_space<vmem>>, %arg12: memref<512x8xbf16, #tpu.memory_space<vmem>>, %arg13: memref<8x8xf32, #tpu.memory_space<vmem>>, %arg14: memref<32x128xf32, #tpu.memory_space<vmem>>, %arg15: memref<8x256xf32, #tpu.memory_space<vmem>>, %arg16: memref<8x512xf32, #tpu.memory_space<vmem>>) attributes {dimension_semantics = [#tpu.dimension_semantics<arbitrary>], iteration_bounds = array<i64: 1>, scalar_prefetch = 0 : i64, scratch_operands = 3 : i64, tpu.core_type = #tpu.core_type<tc>, window_params = [{pipeline_mode = #tpu.pipeline_mode<synchronous>, transform_indices = @transform_0, window_bounds = array<i64: 128, 16>}, {pipeline_mode = #tpu.pipeline_mode<synchronous>, transform_indices = @transform_1, window_bounds = array<i64: 16, 8>}, {pipeline_mode = #tpu.pipeline_mode<synchronous>, transform_indices = @transform_2, window_bounds = array<i64: 512, 128>}, {pipeline_mode = #tpu.pipeline_mode<synchronous>, transform_indices = @transform_3, window_bounds = array<i64: 128, 16>}, {pipeline_mode = #tpu.pipeline_mode<synchronous>, transform_indices = @transform_4, window_bounds = array<i64: 1, 16>}, {pipeline_mode = #tpu.pipeline_mode<synchronous>, transform_indices = @transform_5, window_bounds = array<i64: 1, 16>}, {pipeline_mode = #tpu.pipeline_mode<synchronous>, transform_indices = @transform_6, window_bounds = array<i64: 128, 32>}, {pipeline_mode = #tpu.pipeline_mode<synchronous>, transform_indices = @transform_7, window_bounds = array<i64: 256, 32>}, {pipeline_mode = #tpu.pipeline_mode<synchronous>, transform_indices = @transform_8, window_bounds = array<i64: 1, 32>}, {pipeline_mode = #tpu.pipeline_mode<synchronous>, transform_indices = @transform_9, window_bounds = array<i64: 1, 32>}, {pipeline_mode = #tpu.pipeline_mode<synchronous>, transform_indices = @transform_10, window_bounds = array<i64: 128, 8>}, {pipeline_mode = #tpu.pipeline_mode<synchronous>, transform_indices = @transform_11, window_bounds = array<i64: 512, 8>}, {pipeline_mode = #tpu.pipeline_mode<synchronous>, transform_indices = @transform_12, window_bounds = array<i64: 8, 8>}]} {
    %c0 = arith.constant 0 : index
    %c0_0 = arith.constant 0 : index
    %0 = vector.load %arg1[%c0, %c0_0] : memref<128x16xf32, #tpu.memory_space<vmem>>, vector<128x16xf32>
    %1 = arith.truncf %0 : vector<128x16xf32> to vector<128x16xbf16>
    %c0_1 = arith.constant 0 : index
    %c0_2 = arith.constant 0 : index
    %2 = vector.load %arg2[%c0_1, %c0_2] : memref<16x8xbf16, #tpu.memory_space<vmem>>, vector<16x8xbf16>
    %cst = arith.constant dense<0.000000e+00> : vector<128x8xf32>
    %3 = tpu.matmul %1, %2, %cst {dimension_numbers = #tpu.dot_dimension_numbers<[1], [0], [0], [1], [0, 0, 1, 1], [], []>} : vector<128x16xbf16>, vector<16x8xbf16>, vector<128x8xf32> -> vector<128x8xf32>
    %cst_3 = arith.constant 0.000000e+00 : f32
    %4 = vector.broadcast %cst_3 : f32 to vector<128x8xf32>
    %5 = arith.cmpf ogt, %3, %4 : vector<128x8xf32>
    %cst_4 = arith.constant 2.000000e-01 : f32
    %6 = vector.broadcast %cst_4 : f32 to vector<128x8xf32>
    %7 = arith.mulf %6, %3 : vector<128x8xf32>
    %8 = arith.select %5, %3, %7 : vector<128x8xi1>, vector<128x8xf32>
    %c0_5 = arith.constant 0 : index
    %c0_6 = arith.constant 0 : index
    %9 = vector.load %arg3[%c0_5, %c0_6] : memref<512x128xbf16, #tpu.memory_space<vmem>>, vector<512x128xbf16>
    %10 = arith.truncf %8 : vector<128x8xf32> to vector<128x8xbf16>
    %cst_7 = arith.constant dense<0.000000e+00> : vector<512x8xf32>
    %11 = tpu.matmul %9, %10, %cst_7 {dimension_numbers = #tpu.dot_dimension_numbers<[1], [0], [0], [1], [0, 0, 1, 1], [], []>} : vector<512x128xbf16>, vector<128x8xbf16>, vector<512x8xf32> -> vector<512x8xf32>
    %12 = vector.extract_strided_slice %11 {offsets = [0, 0], sizes = [32, 8], strides = [1, 1]} : vector<512x8xf32> to vector<32x8xf32>
    %c0_8 = arith.constant 0 : index
    %c0_9 = arith.constant 0 : index
    %13 = vector.load %arg14[%c0_8, %c0_9] : memref<32x128xf32, #tpu.memory_space<vmem>>, vector<32x8xf32>
    tpu.vector_store %arg14[%c0_8, %c0_9], %12 {strides = array<i32>} : memref<32x128xf32, #tpu.memory_space<vmem>>, vector<32x8xf32>,
    %14 = vector.extract_strided_slice %11 {offsets = [32, 0], sizes = [32, 8], strides = [1, 1]} : vector<512x8xf32> to vector<32x8xf32>
    %c0_10 = arith.constant 0 : index
    %c8 = arith.constant 8 : index
    %15 = vector.load %arg14[%c0_10, %c8] : memref<32x128xf32, #tpu.memory_space<vmem>>, vector<32x8xf32>
    tpu.vector_store %arg14[%c0_10, %c8], %14 {strides = array<i32>} : memref<32x128xf32, #tpu.memory_space<vmem>>, vector<32x8xf32>,
    %16 = vector.extract_strided_slice %11 {offsets = [64, 0], sizes = [32, 8], strides = [1, 1]} : vector<512x8xf32> to vector<32x8xf32>
    %c0_11 = arith.constant 0 : index
    %c16 = arith.constant 16 : index
    %17 = vector.load %arg14[%c0_11, %c16] : memref<32x128xf32, #tpu.memory_space<vmem>>, vector<32x8xf32>
    tpu.vector_store %arg14[%c0_11, %c16], %16 {strides = array<i32>} : memref<32x128xf32, #tpu.memory_space<vmem>>, vector<32x8xf32>,
    %18 = vector.extract_strided_slice %11 {offsets = [96, 0], sizes = [32, 8], strides = [1, 1]} : vector<512x8xf32> to vector<32x8xf32>
    %c0_12 = arith.constant 0 : index
    %c24 = arith.constant 24 : index
    %19 = vector.load %arg14[%c0_12, %c24] : memref<32x128xf32, #tpu.memory_space<vmem>>, vector<32x8xf32>
    tpu.vector_store %arg14[%c0_12, %c24], %18 {strides = array<i32>} : memref<32x128xf32, #tpu.memory_space<vmem>>, vector<32x8xf32>,
    %20 = vector.extract_strided_slice %11 {offsets = [128, 0], sizes = [32, 8], strides = [1, 1]} : vector<512x8xf32> to vector<32x8xf32>
    %c0_13 = arith.constant 0 : index
    %c32 = arith.constant 32 : index
    %21 = vector.load %arg14[%c0_13, %c32] : memref<32x128xf32, #tpu.memory_space<vmem>>, vector<32x8xf32>
    tpu.vector_store %arg14[%c0_13, %c32], %20 {strides = array<i32>} : memref<32x128xf32, #tpu.memory_space<vmem>>, vector<32x8xf32>,
    %22 = vector.extract_strided_slice %11 {offsets = [160, 0], sizes = [32, 8], strides = [1, 1]} : vector<512x8xf32> to vector<32x8xf32>
    %c0_14 = arith.constant 0 : index
    %c40 = arith.constant 40 : index
    %23 = vector.load %arg14[%c0_14, %c40] : memref<32x128xf32, #tpu.memory_space<vmem>>, vector<32x8xf32>
    tpu.vector_store %arg14[%c0_14, %c40], %22 {strides = array<i32>} : memref<32x128xf32, #tpu.memory_space<vmem>>, vector<32x8xf32>,
    %24 = vector.extract_strided_slice %11 {offsets = [192, 0], sizes = [32, 8], strides = [1, 1]} : vector<512x8xf32> to vector<32x8xf32>
    %c0_15 = arith.constant 0 : index
    %c48 = arith.constant 48 : index
    %25 = vector.load %arg14[%c0_15, %c48] : memref<32x128xf32, #tpu.memory_space<vmem>>, vector<32x8xf32>
    tpu.vector_store %arg14[%c0_15, %c48], %24 {strides = array<i32>} : memref<32x128xf32, #tpu.memory_space<vmem>>, vector<32x8xf32>,
    %26 = vector.extract_strided_slice %11 {offsets = [224, 0], sizes = [32, 8], strides = [1, 1]} : vector<512x8xf32> to vector<32x8xf32>
    %c0_16 = arith.constant 0 : index
    %c56 = arith.constant 56 : index
    %27 = vector.load %arg14[%c0_16, %c56] : memref<32x128xf32, #tpu.memory_space<vmem>>, vector<32x8xf32>
    tpu.vector_store %arg14[%c0_16, %c56], %26 {strides = array<i32>} : memref<32x128xf32, #tpu.memory_space<vmem>>, vector<32x8xf32>,
    %28 = vector.extract_strided_slice %11 {offsets = [256, 0], sizes = [32, 8], strides = [1, 1]} : vector<512x8xf32> to vector<32x8xf32>
    %c0_17 = arith.constant 0 : index
    %c64 = arith.constant 64 : index
    %29 = vector.load %arg14[%c0_17, %c64] : memref<32x128xf32, #tpu.memory_space<vmem>>, vector<32x8xf32>
    tpu.vector_store %arg14[%c0_17, %c64], %28 {strides = array<i32>} : memref<32x128xf32, #tpu.memory_space<vmem>>, vector<32x8xf32>,
    %30 = vector.extract_strided_slice %11 {offsets = [288, 0], sizes = [32, 8], strides = [1, 1]} : vector<512x8xf32> to vector<32x8xf32>
    %c0_18 = arith.constant 0 : index
    %c72 = arith.constant 72 : index
    %31 = vector.load %arg14[%c0_18, %c72] : memref<32x128xf32, #tpu.memory_space<vmem>>, vector<32x8xf32>
    tpu.vector_store %arg14[%c0_18, %c72], %30 {strides = array<i32>} : memref<32x128xf32, #tpu.memory_space<vmem>>, vector<32x8xf32>,
    %32 = vector.extract_strided_slice %11 {offsets = [320, 0], sizes = [32, 8], strides = [1, 1]} : vector<512x8xf32> to vector<32x8xf32>
    %c0_19 = arith.constant 0 : index
    %c80 = arith.constant 80 : index
    %33 = vector.load %arg14[%c0_19, %c80] : memref<32x128xf32, #tpu.memory_space<vmem>>, vector<32x8xf32>
    tpu.vector_store %arg14[%c0_19, %c80], %32 {strides = array<i32>} : memref<32x128xf32, #tpu.memory_space<vmem>>, vector<32x8xf32>,
    %34 = vector.extract_strided_slice %11 {offsets = [352, 0], sizes = [32, 8], strides = [1, 1]} : vector<512x8xf32> to vector<32x8xf32>
    %c0_20 = arith.constant 0 : index
    %c88 = arith.constant 88 : index
    %35 = vector.load %arg14[%c0_20, %c88] : memref<32x128xf32, #tpu.memory_space<vmem>>, vector<32x8xf32>
    tpu.vector_store %arg14[%c0_20, %c88], %34 {strides = array<i32>} : memref<32x128xf32, #tpu.memory_space<vmem>>, vector<32x8xf32>,
    %36 = vector.extract_strided_slice %11 {offsets = [384, 0], sizes = [32, 8], strides = [1, 1]} : vector<512x8xf32> to vector<32x8xf32>
    %c0_21 = arith.constant 0 : index
    %c96 = arith.constant 96 : index
    %37 = vector.load %arg14[%c0_21, %c96] : memref<32x128xf32, #tpu.memory_space<vmem>>, vector<32x8xf32>
    tpu.vector_store %arg14[%c0_21, %c96], %36 {strides = array<i32>} : memref<32x128xf32, #tpu.memory_space<vmem>>, vector<32x8xf32>,
    %38 = vector.extract_strided_slice %11 {offsets = [416, 0], sizes = [32, 8], strides = [1, 1]} : vector<512x8xf32> to vector<32x8xf32>
    %c0_22 = arith.constant 0 : index
    %c104 = arith.constant 104 : index
    %39 = vector.load %arg14[%c0_22, %c104] : memref<32x128xf32, #tpu.memory_space<vmem>>, vector<32x8xf32>
    tpu.vector_store %arg14[%c0_22, %c104], %38 {strides = array<i32>} : memref<32x128xf32, #tpu.memory_space<vmem>>, vector<32x8xf32>,
    %40 = vector.extract_strided_slice %11 {offsets = [448, 0], sizes = [32, 8], strides = [1, 1]} : vector<512x8xf32> to vector<32x8xf32>
    %c0_23 = arith.constant 0 : index
    %c112 = arith.constant 112 : index
    %41 = vector.load %arg14[%c0_23, %c112] : memref<32x128xf32, #tpu.memory_space<vmem>>, vector<32x8xf32>
    tpu.vector_store %arg14[%c0_23, %c112], %40 {strides = array<i32>} : memref<32x128xf32, #tpu.memory_space<vmem>>, vector<32x8xf32>,
    %42 = vector.extract_strided_slice %11 {offsets = [480, 0], sizes = [32, 8], strides = [1, 1]} : vector<512x8xf32> to vector<32x8xf32>
    %c0_24 = arith.constant 0 : index
    %c120 = arith.constant 120 : index
    %43 = vector.load %arg14[%c0_24, %c120] : memref<32x128xf32, #tpu.memory_space<vmem>>, vector<32x8xf32>
    tpu.vector_store %arg14[%c0_24, %c120], %42 {strides = array<i32>} : memref<32x128xf32, #tpu.memory_space<vmem>>, vector<32x8xf32>,
    %c0_25 = arith.constant 0 : index
    %c0_26 = arith.constant 0 : index
    %44 = vector.load %arg14[%c0_25, %c0_26] : memref<32x128xf32, #tpu.memory_space<vmem>>, vector<32x128xf32>
    %45 = arith.truncf %44 : vector<32x128xf32> to vector<32x128xbf16>
    %c0_27 = arith.constant 0 : index
    %c0_28 = arith.constant 0 : index
    %46 = vector.load %arg4[%c0_27, %c0_28] : memref<128x16xbf16, #tpu.memory_space<vmem>>, vector<128x16xbf16>
    %cst_29 = arith.constant dense<0.000000e+00> : vector<32x16xf32>
    %47 = tpu.matmul %45, %46, %cst_29 {dimension_numbers = #tpu.dot_dimension_numbers<[1], [0], [0], [1], [0, 0, 1, 1], [], []>} : vector<32x128xbf16>, vector<128x16xbf16>, vector<32x16xf32> -> vector<32x16xf32>
    %c0_30 = arith.constant 0 : index
    %c0_31 = arith.constant 0 : index
    %48 = vector.load %arg5[%c0_30, %c0_31] : memref<1x16xf32, #tpu.memory_space<vmem>>, vector<1x16xf32>
    %c0_32 = arith.constant 0 : index
    %c0_33 = arith.constant 0 : index
    %49 = vector.load %arg6[%c0_32, %c0_33] : memref<1x16xf32, #tpu.memory_space<vmem>>, vector<1x16xf32>
    %cst_34 = arith.constant dense<0.000000e+00> : vector<16xf32>
    %50 = vector.multi_reduction <add>, %47, %cst_34 [0] : vector<32x16xf32> to vector<16xf32>
    %51 = vector.shape_cast %50 : vector<16xf32> to vector<1x16xf32>
    %cst_35 = arith.constant 3.200000e+01 : f32
    %52 = vector.broadcast %cst_35 : f32 to vector<1x16xf32>
    %53 = arith.divf %51, %52 : vector<1x16xf32>
    %54 = vector.broadcast %53 : vector<1x16xf32> to vector<32x16xf32>
    %55 = arith.subf %47, %54 : vector<32x16xf32>
    %56 = arith.mulf %55, %55 : vector<32x16xf32>
    %cst_36 = arith.constant dense<0.000000e+00> : vector<16xf32>
    %57 = vector.multi_reduction <add>, %56, %cst_36 [0] : vector<32x16xf32> to vector<16xf32>
    %58 = vector.shape_cast %57 : vector<16xf32> to vector<1x16xf32>
    %cst_37 = arith.constant 3.200000e+01 : f32
    %59 = vector.broadcast %cst_37 : f32 to vector<1x16xf32>
    %60 = arith.divf %58, %59 : vector<1x16xf32>
    %61 = vector.broadcast %53 : vector<1x16xf32> to vector<32x16xf32>
    %62 = arith.subf %47, %61 : vector<32x16xf32>
    %cst_38 = arith.constant 9.99999974E-6 : f32
    %63 = vector.broadcast %cst_38 : f32 to vector<1x16xf32>
    %64 = arith.addf %60, %63 : vector<1x16xf32>
    %65 = math.rsqrt %64 : vector<1x16xf32>
    %66 = vector.broadcast %65 : vector<1x16xf32> to vector<32x16xf32>
    %67 = arith.mulf %62, %66 : vector<32x16xf32>
    %68 = vector.broadcast %48 : vector<1x16xf32> to vector<32x16xf32>
    %69 = arith.mulf %67, %68 : vector<32x16xf32>
    %70 = vector.broadcast %49 : vector<1x16xf32> to vector<32x16xf32>
    %71 = arith.addf %69, %70 : vector<32x16xf32>
    %cst_39 = arith.constant 0.000000e+00 : f32
    %72 = vector.broadcast %cst_39 : f32 to vector<32x16xf32>
    %73 = arith.cmpf ogt, %71, %72 : vector<32x16xf32>
    %cst_40 = arith.constant 2.000000e-01 : f32
    %74 = vector.broadcast %cst_40 : f32 to vector<32x16xf32>
    %75 = arith.mulf %74, %71 : vector<32x16xf32>
    %76 = arith.select %73, %71, %75 : vector<32x16xi1>, vector<32x16xf32>
    %c0_41 = arith.constant 0 : index
    %c0_42 = arith.constant 0 : index
    %77 = vector.load %arg7[%c0_41, %c0_42] : memref<128x32xbf16, #tpu.memory_space<vmem>>, vector<128x32xbf16>
    %78 = arith.truncf %76 : vector<32x16xf32> to vector<32x16xbf16>
    %cst_43 = arith.constant dense<0.000000e+00> : vector<128x16xf32>
    %79 = tpu.matmul %77, %78, %cst_43 {dimension_numbers = #tpu.dot_dimension_numbers<[1], [0], [0], [1], [0, 0, 1, 1], [], []>} : vector<128x32xbf16>, vector<32x16xbf16>, vector<128x16xf32> -> vector<128x16xf32>
    %80 = vector.extract_strided_slice %79 {offsets = [0, 0], sizes = [8, 16], strides = [1, 1]} : vector<128x16xf32> to vector<8x16xf32>
    %c0_44 = arith.constant 0 : index
    %c0_45 = arith.constant 0 : index
    %81 = vector.load %arg15[%c0_44, %c0_45] : memref<8x256xf32, #tpu.memory_space<vmem>>, vector<8x16xf32>
    tpu.vector_store %arg15[%c0_44, %c0_45], %80 {strides = array<i32>} : memref<8x256xf32, #tpu.memory_space<vmem>>, vector<8x16xf32>,
    %82 = vector.extract_strided_slice %79 {offsets = [8, 0], sizes = [8, 16], strides = [1, 1]} : vector<128x16xf32> to vector<8x16xf32>
    %c0_46 = arith.constant 0 : index
    %c16_47 = arith.constant 16 : index
    %83 = vector.load %arg15[%c0_46, %c16_47] : memref<8x256xf32, #tpu.memory_space<vmem>>, vector<8x16xf32>
    tpu.vector_store %arg15[%c0_46, %c16_47], %82 {strides = array<i32>} : memref<8x256xf32, #tpu.memory_space<vmem>>, vector<8x16xf32>,
    %84 = vector.extract_strided_slice %79 {offsets = [16, 0], sizes = [8, 16], strides = [1, 1]} : vector<128x16xf32> to vector<8x16xf32>
    %c0_48 = arith.constant 0 : index
    %c32_49 = arith.constant 32 : index
    %85 = vector.load %arg15[%c0_48, %c32_49] : memref<8x256xf32, #tpu.memory_space<vmem>>, vector<8x16xf32>
    tpu.vector_store %arg15[%c0_48, %c32_49], %84 {strides = array<i32>} : memref<8x256xf32, #tpu.memory_space<vmem>>, vector<8x16xf32>,
    %86 = vector.extract_strided_slice %79 {offsets = [24, 0], sizes = [8, 16], strides = [1, 1]} : vector<128x16xf32> to vector<8x16xf32>
    %c0_50 = arith.constant 0 : index
    %c48_51 = arith.constant 48 : index
    %87 = vector.load %arg15[%c0_50, %c48_51] : memref<8x256xf32, #tpu.memory_space<vmem>>, vector<8x16xf32>
    tpu.vector_store %arg15[%c0_50, %c48_51], %86 {strides = array<i32>} : memref<8x256xf32, #tpu.memory_space<vmem>>, vector<8x16xf32>,
    %88 = vector.extract_strided_slice %79 {offsets = [32, 0], sizes = [8, 16], strides = [1, 1]} : vector<128x16xf32> to vector<8x16xf32>
    %c0_52 = arith.constant 0 : index
    %c64_53 = arith.constant 64 : index
    %89 = vector.load %arg15[%c0_52, %c64_53] : memref<8x256xf32, #tpu.memory_space<vmem>>, vector<8x16xf32>
    tpu.vector_store %arg15[%c0_52, %c64_53], %88 {strides = array<i32>} : memref<8x256xf32, #tpu.memory_space<vmem>>, vector<8x16xf32>,
    %90 = vector.extract_strided_slice %79 {offsets = [40, 0], sizes = [8, 16], strides = [1, 1]} : vector<128x16xf32> to vector<8x16xf32>
    %c0_54 = arith.constant 0 : index
    %c80_55 = arith.constant 80 : index
    %91 = vector.load %arg15[%c0_54, %c80_55] : memref<8x256xf32, #tpu.memory_space<vmem>>, vector<8x16xf32>
    tpu.vector_store %arg15[%c0_54, %c80_55], %90 {strides = array<i32>} : memref<8x256xf32, #tpu.memory_space<vmem>>, vector<8x16xf32>,
    %92 = vector.extract_strided_slice %79 {offsets = [48, 0], sizes = [8, 16], strides = [1, 1]} : vector<128x16xf32> to vector<8x16xf32>
    %c0_56 = arith.constant 0 : index
    %c96_57 = arith.constant 96 : index
    %93 = vector.load %arg15[%c0_56, %c96_57] : memref<8x256xf32, #tpu.memory_space<vmem>>, vector<8x16xf32>
    tpu.vector_store %arg15[%c0_56, %c96_57], %92 {strides = array<i32>} : memref<8x256xf32, #tpu.memory_space<vmem>>, vector<8x16xf32>,
    %94 = vector.extract_strided_slice %79 {offsets = [56, 0], sizes = [8, 16], strides = [1, 1]} : vector<128x16xf32> to vector<8x16xf32>
    %c0_58 = arith.constant 0 : index
    %c112_59 = arith.constant 112 : index
    %95 = vector.load %arg15[%c0_58, %c112_59] : memref<8x256xf32, #tpu.memory_space<vmem>>, vector<8x16xf32>
    tpu.vector_store %arg15[%c0_58, %c112_59], %94 {strides = array<i32>} : memref<8x256xf32, #tpu.memory_space<vmem>>, vector<8x16xf32>,
    %96 = vector.extract_strided_slice %79 {offsets = [64, 0], sizes = [8, 16], strides = [1, 1]} : vector<128x16xf32> to vector<8x16xf32>
    %c0_60 = arith.constant 0 : index
    %c128 = arith.constant 128 : index
    %97 = vector.load %arg15[%c0_60, %c128] : memref<8x256xf32, #tpu.memory_space<vmem>>, vector<8x16xf32>
    tpu.vector_store %arg15[%c0_60, %c128], %96 {strides = array<i32>} : memref<8x256xf32, #tpu.memory_space<vmem>>, vector<8x16xf32>,
    %98 = vector.extract_strided_slice %79 {offsets = [72, 0], sizes = [8, 16], strides = [1, 1]} : vector<128x16xf32> to vector<8x16xf32>
    %c0_61 = arith.constant 0 : index
    %c144 = arith.constant 144 : index
    %99 = vector.load %arg15[%c0_61, %c144] : memref<8x256xf32, #tpu.memory_space<vmem>>, vector<8x16xf32>
    tpu.vector_store %arg15[%c0_61, %c144], %98 {strides = array<i32>} : memref<8x256xf32, #tpu.memory_space<vmem>>, vector<8x16xf32>,
    %100 = vector.extract_strided_slice %79 {offsets = [80, 0], sizes = [8, 16], strides = [1, 1]} : vector<128x16xf32> to vector<8x16xf32>
    %c0_62 = arith.constant 0 : index
    %c160 = arith.constant 160 : index
    %101 = vector.load %arg15[%c0_62, %c160] : memref<8x256xf32, #tpu.memory_space<vmem>>, vector<8x16xf32>
    tpu.vector_store %arg15[%c0_62, %c160], %100 {strides = array<i32>} : memref<8x256xf32, #tpu.memory_space<vmem>>, vector<8x16xf32>,
    %102 = vector.extract_strided_slice %79 {offsets = [88, 0], sizes = [8, 16], strides = [1, 1]} : vector<128x16xf32> to vector<8x16xf32>
    %c0_63 = arith.constant 0 : index
    %c176 = arith.constant 176 : index
    %103 = vector.load %arg15[%c0_63, %c176] : memref<8x256xf32, #tpu.memory_space<vmem>>, vector<8x16xf32>
    tpu.vector_store %arg15[%c0_63, %c176], %102 {strides = array<i32>} : memref<8x256xf32, #tpu.memory_space<vmem>>, vector<8x16xf32>,
    %104 = vector.extract_strided_slice %79 {offsets = [96, 0], sizes = [8, 16], strides = [1, 1]} : vector<128x16xf32> to vector<8x16xf32>
    %c0_64 = arith.constant 0 : index
    %c192 = arith.constant 192 : index
    %105 = vector.load %arg15[%c0_64, %c192] : memref<8x256xf32, #tpu.memory_space<vmem>>, vector<8x16xf32>
    tpu.vector_store %arg15[%c0_64, %c192], %104 {strides = array<i32>} : memref<8x256xf32, #tpu.memory_space<vmem>>, vector<8x16xf32>,
    %106 = vector.extract_strided_slice %79 {offsets = [104, 0], sizes = [8, 16], strides = [1, 1]} : vector<128x16xf32> to vector<8x16xf32>
    %c0_65 = arith.constant 0 : index
    %c208 = arith.constant 208 : index
    %107 = vector.load %arg15[%c0_65, %c208] : memref<8x256xf32, #tpu.memory_space<vmem>>, vector<8x16xf32>
    tpu.vector_store %arg15[%c0_65, %c208], %106 {strides = array<i32>} : memref<8x256xf32, #tpu.memory_space<vmem>>, vector<8x16xf32>,
    %108 = vector.extract_strided_slice %79 {offsets = [112, 0], sizes = [8, 16], strides = [1, 1]} : vector<128x16xf32> to vector<8x16xf32>
    %c0_66 = arith.constant 0 : index
    %c224 = arith.constant 224 : index
    %109 = vector.load %arg15[%c0_66, %c224] : memref<8x256xf32, #tpu.memory_space<vmem>>, vector<8x16xf32>
    tpu.vector_store %arg15[%c0_66, %c224], %108 {strides = array<i32>} : memref<8x256xf32, #tpu.memory_space<vmem>>, vector<8x16xf32>,
    %110 = vector.extract_strided_slice %79 {offsets = [120, 0], sizes = [8, 16], strides = [1, 1]} : vector<128x16xf32> to vector<8x16xf32>
    %c0_67 = arith.constant 0 : index
    %c240 = arith.constant 240 : index
    %111 = vector.load %arg15[%c0_67, %c240] : memref<8x256xf32, #tpu.memory_space<vmem>>, vector<8x16xf32>
    tpu.vector_store %arg15[%c0_67, %c240], %110 {strides = array<i32>} : memref<8x256xf32, #tpu.memory_space<vmem>>, vector<8x16xf32>,
    %c0_68 = arith.constant 0 : index
    %c0_69 = arith.constant 0 : index
    %112 = vector.load %arg15[%c0_68, %c0_69] : memref<8x256xf32, #tpu.memory_space<vmem>>, vector<8x256xf32>
    %113 = arith.truncf %112 : vector<8x256xf32> to vector<8x256xbf16>
    %c0_70 = arith.constant 0 : index
    %c0_71 = arith.constant 0 : index
    %114 = vector.load %arg8[%c0_70, %c0_71] : memref<256x32xbf16, #tpu.memory_space<vmem>>, vector<256x32xbf16>
    %cst_72 = arith.constant dense<0.000000e+00> : vector<8x32xf32>
    %115 = tpu.matmul %113, %114, %cst_72 {dimension_numbers = #tpu.dot_dimension_numbers<[1], [0], [0], [1], [0, 0, 1, 1], [], []>} : vector<8x256xbf16>, vector<256x32xbf16>, vector<8x32xf32> -> vector<8x32xf32>
    %c0_73 = arith.constant 0 : index
    %c0_74 = arith.constant 0 : index
    %116 = vector.load %arg9[%c0_73, %c0_74] : memref<1x32xf32, #tpu.memory_space<vmem>>, vector<1x32xf32>
    %c0_75 = arith.constant 0 : index
    %c0_76 = arith.constant 0 : index
    %117 = vector.load %arg10[%c0_75, %c0_76] : memref<1x32xf32, #tpu.memory_space<vmem>>, vector<1x32xf32>
    %cst_77 = arith.constant dense<0.000000e+00> : vector<32xf32>
    %118 = vector.multi_reduction <add>, %115, %cst_77 [0] : vector<8x32xf32> to vector<32xf32>
    %119 = vector.shape_cast %118 : vector<32xf32> to vector<1x32xf32>
    %cst_78 = arith.constant 8.000000e+00 : f32
    %120 = vector.broadcast %cst_78 : f32 to vector<1x32xf32>
    %121 = arith.divf %119, %120 : vector<1x32xf32>
    %122 = vector.broadcast %121 : vector<1x32xf32> to vector<8x32xf32>
    %123 = arith.subf %115, %122 : vector<8x32xf32>
    %124 = arith.mulf %123, %123 : vector<8x32xf32>
    %cst_79 = arith.constant dense<0.000000e+00> : vector<32xf32>
    %125 = vector.multi_reduction <add>, %124, %cst_79 [0] : vector<8x32xf32> to vector<32xf32>
    %126 = vector.shape_cast %125 : vector<32xf32> to vector<1x32xf32>
    %cst_80 = arith.constant 8.000000e+00 : f32
    %127 = vector.broadcast %cst_80 : f32 to vector<1x32xf32>
    %128 = arith.divf %126, %127 : vector<1x32xf32>
    %129 = vector.broadcast %121 : vector<1x32xf32> to vector<8x32xf32>
    %130 = arith.subf %115, %129 : vector<8x32xf32>
    %cst_81 = arith.constant 9.99999974E-6 : f32
    %131 = vector.broadcast %cst_81 : f32 to vector<1x32xf32>
    %132 = arith.addf %128, %131 : vector<1x32xf32>
    %133 = math.rsqrt %132 : vector<1x32xf32>
    %134 = vector.broadcast %133 : vector<1x32xf32> to vector<8x32xf32>
    %135 = arith.mulf %130, %134 : vector<8x32xf32>
    %136 = vector.broadcast %116 : vector<1x32xf32> to vector<8x32xf32>
    %137 = arith.mulf %135, %136 : vector<8x32xf32>
    %138 = vector.broadcast %117 : vector<1x32xf32> to vector<8x32xf32>
    %139 = arith.addf %137, %138 : vector<8x32xf32>
    %cst_82 = arith.constant 0.000000e+00 : f32
    %140 = vector.broadcast %cst_82 : f32 to vector<8x32xf32>
    %141 = arith.cmpf ogt, %139, %140 : vector<8x32xf32>
    %cst_83 = arith.constant 2.000000e-01 : f32
    %142 = vector.broadcast %cst_83 : f32 to vector<8x32xf32>
    %143 = arith.mulf %142, %139 : vector<8x32xf32>
    %144 = arith.select %141, %139, %143 : vector<8x32xi1>, vector<8x32xf32>
    %c0_84 = arith.constant 0 : index
    %c0_85 = arith.constant 0 : index
    %145 = vector.load %arg11[%c0_84, %c0_85] : memref<128x8xbf16, #tpu.memory_space<vmem>>, vector<128x8xbf16>
    %146 = arith.truncf %144 : vector<8x32xf32> to vector<8x32xbf16>
    %cst_86 = arith.constant dense<0.000000e+00> : vector<128x32xf32>
    %147 = tpu.matmul %145, %146, %cst_86 {dimension_numbers = #tpu.dot_dimension_numbers<[1], [0], [0], [1], [0, 0, 1, 1], [], []>} : vector<128x8xbf16>, vector<8x32xbf16>, vector<128x32xf32> -> vector<128x32xf32>
    %148 = vector.extract_strided_slice %147 {offsets = [0, 0], sizes = [8, 32], strides = [1, 1]} : vector<128x32xf32> to vector<8x32xf32>
    %c0_87 = arith.constant 0 : index
    %c0_88 = arith.constant 0 : index
    %149 = vector.load %arg16[%c0_87, %c0_88] : memref<8x512xf32, #tpu.memory_space<vmem>>, vector<8x32xf32>
    tpu.vector_store %arg16[%c0_87, %c0_88], %148 {strides = array<i32>} : memref<8x512xf32, #tpu.memory_space<vmem>>, vector<8x32xf32>,
    %150 = vector.extract_strided_slice %147 {offsets = [8, 0], sizes = [8, 32], strides = [1, 1]} : vector<128x32xf32> to vector<8x32xf32>
    %c0_89 = arith.constant 0 : index
    %c32_90 = arith.constant 32 : index
    %151 = vector.load %arg16[%c0_89, %c32_90] : memref<8x512xf32, #tpu.memory_space<vmem>>, vector<8x32xf32>
    tpu.vector_store %arg16[%c0_89, %c32_90], %150 {strides = array<i32>} : memref<8x512xf32, #tpu.memory_space<vmem>>, vector<8x32xf32>,
    %152 = vector.extract_strided_slice %147 {offsets = [16, 0], sizes = [8, 32], strides = [1, 1]} : vector<128x32xf32> to vector<8x32xf32>
    %c0_91 = arith.constant 0 : index
    %c64_92 = arith.constant 64 : index
    %153 = vector.load %arg16[%c0_91, %c64_92] : memref<8x512xf32, #tpu.memory_space<vmem>>, vector<8x32xf32>
    tpu.vector_store %arg16[%c0_91, %c64_92], %152 {strides = array<i32>} : memref<8x512xf32, #tpu.memory_space<vmem>>, vector<8x32xf32>,
    %154 = vector.extract_strided_slice %147 {offsets = [24, 0], sizes = [8, 32], strides = [1, 1]} : vector<128x32xf32> to vector<8x32xf32>
    %c0_93 = arith.constant 0 : index
    %c96_94 = arith.constant 96 : index
    %155 = vector.load %arg16[%c0_93, %c96_94] : memref<8x512xf32, #tpu.memory_space<vmem>>, vector<8x32xf32>
    tpu.vector_store %arg16[%c0_93, %c96_94], %154 {strides = array<i32>} : memref<8x512xf32, #tpu.memory_space<vmem>>, vector<8x32xf32>,
    %156 = vector.extract_strided_slice %147 {offsets = [32, 0], sizes = [8, 32], strides = [1, 1]} : vector<128x32xf32> to vector<8x32xf32>
    %c0_95 = arith.constant 0 : index
    %c128_96 = arith.constant 128 : index
    %157 = vector.load %arg16[%c0_95, %c128_96] : memref<8x512xf32, #tpu.memory_space<vmem>>, vector<8x32xf32>
    tpu.vector_store %arg16[%c0_95, %c128_96], %156 {strides = array<i32>} : memref<8x512xf32, #tpu.memory_space<vmem>>, vector<8x32xf32>,
    %158 = vector.extract_strided_slice %147 {offsets = [40, 0], sizes = [8, 32], strides = [1, 1]} : vector<128x32xf32> to vector<8x32xf32>
    %c0_97 = arith.constant 0 : index
    %c160_98 = arith.constant 160 : index
    %159 = vector.load %arg16[%c0_97, %c160_98] : memref<8x512xf32, #tpu.memory_space<vmem>>, vector<8x32xf32>
    tpu.vector_store %arg16[%c0_97, %c160_98], %158 {strides = array<i32>} : memref<8x512xf32, #tpu.memory_space<vmem>>, vector<8x32xf32>,
    %160 = vector.extract_strided_slice %147 {offsets = [48, 0], sizes = [8, 32], strides = [1, 1]} : vector<128x32xf32> to vector<8x32xf32>
    %c0_99 = arith.constant 0 : index
    %c192_100 = arith.constant 192 : index
    %161 = vector.load %arg16[%c0_99, %c192_100] : memref<8x512xf32, #tpu.memory_space<vmem>>, vector<8x32xf32>
    tpu.vector_store %arg16[%c0_99, %c192_100], %160 {strides = array<i32>} : memref<8x512xf32, #tpu.memory_space<vmem>>, vector<8x32xf32>,
    %162 = vector.extract_strided_slice %147 {offsets = [56, 0], sizes = [8, 32], strides = [1, 1]} : vector<128x32xf32> to vector<8x32xf32>
    %c0_101 = arith.constant 0 : index
    %c224_102 = arith.constant 224 : index
    %163 = vector.load %arg16[%c0_101, %c224_102] : memref<8x512xf32, #tpu.memory_space<vmem>>, vector<8x32xf32>
    tpu.vector_store %arg16[%c0_101, %c224_102], %162 {strides = array<i32>} : memref<8x512xf32, #tpu.memory_space<vmem>>, vector<8x32xf32>,
    %164 = vector.extract_strided_slice %147 {offsets = [64, 0], sizes = [8, 32], strides = [1, 1]} : vector<128x32xf32> to vector<8x32xf32>
    %c0_103 = arith.constant 0 : index
    %c256 = arith.constant 256 : index
    %165 = vector.load %arg16[%c0_103, %c256] : memref<8x512xf32, #tpu.memory_space<vmem>>, vector<8x32xf32>
    tpu.vector_store %arg16[%c0_103, %c256], %164 {strides = array<i32>} : memref<8x512xf32, #tpu.memory_space<vmem>>, vector<8x32xf32>,
    %166 = vector.extract_strided_slice %147 {offsets = [72, 0], sizes = [8, 32], strides = [1, 1]} : vector<128x32xf32> to vector<8x32xf32>
    %c0_104 = arith.constant 0 : index
    %c288 = arith.constant 288 : index
    %167 = vector.load %arg16[%c0_104, %c288] : memref<8x512xf32, #tpu.memory_space<vmem>>, vector<8x32xf32>
    tpu.vector_store %arg16[%c0_104, %c288], %166 {strides = array<i32>} : memref<8x512xf32, #tpu.memory_space<vmem>>, vector<8x32xf32>,
    %168 = vector.extract_strided_slice %147 {offsets = [80, 0], sizes = [8, 32], strides = [1, 1]} : vector<128x32xf32> to vector<8x32xf32>
    %c0_105 = arith.constant 0 : index
    %c320 = arith.constant 320 : index
    %169 = vector.load %arg16[%c0_105, %c320] : memref<8x512xf32, #tpu.memory_space<vmem>>, vector<8x32xf32>
    tpu.vector_store %arg16[%c0_105, %c320], %168 {strides = array<i32>} : memref<8x512xf32, #tpu.memory_space<vmem>>, vector<8x32xf32>,
    %170 = vector.extract_strided_slice %147 {offsets = [88, 0], sizes = [8, 32], strides = [1, 1]} : vector<128x32xf32> to vector<8x32xf32>
    %c0_106 = arith.constant 0 : index
    %c352 = arith.constant 352 : index
    %171 = vector.load %arg16[%c0_106, %c352] : memref<8x512xf32, #tpu.memory_space<vmem>>, vector<8x32xf32>
    tpu.vector_store %arg16[%c0_106, %c352], %170 {strides = array<i32>} : memref<8x512xf32, #tpu.memory_space<vmem>>, vector<8x32xf32>,
    %172 = vector.extract_strided_slice %147 {offsets = [96, 0], sizes = [8, 32], strides = [1, 1]} : vector<128x32xf32> to vector<8x32xf32>
    %c0_107 = arith.constant 0 : index
    %c384 = arith.constant 384 : index
    %173 = vector.load %arg16[%c0_107, %c384] : memref<8x512xf32, #tpu.memory_space<vmem>>, vector<8x32xf32>
    tpu.vector_store %arg16[%c0_107, %c384], %172 {strides = array<i32>} : memref<8x512xf32, #tpu.memory_space<vmem>>, vector<8x32xf32>,
    %174 = vector.extract_strided_slice %147 {offsets = [104, 0], sizes = [8, 32], strides = [1, 1]} : vector<128x32xf32> to vector<8x32xf32>
    %c0_108 = arith.constant 0 : index
    %c416 = arith.constant 416 : index
    %175 = vector.load %arg16[%c0_108, %c416] : memref<8x512xf32, #tpu.memory_space<vmem>>, vector<8x32xf32>
    tpu.vector_store %arg16[%c0_108, %c416], %174 {strides = array<i32>} : memref<8x512xf32, #tpu.memory_space<vmem>>, vector<8x32xf32>,
    %176 = vector.extract_strided_slice %147 {offsets = [112, 0], sizes = [8, 32], strides = [1, 1]} : vector<128x32xf32> to vector<8x32xf32>
    %c0_109 = arith.constant 0 : index
    %c448 = arith.constant 448 : index
    %177 = vector.load %arg16[%c0_109, %c448] : memref<8x512xf32, #tpu.memory_space<vmem>>, vector<8x32xf32>
    tpu.vector_store %arg16[%c0_109, %c448], %176 {strides = array<i32>} : memref<8x512xf32, #tpu.memory_space<vmem>>, vector<8x32xf32>,
    %178 = vector.extract_strided_slice %147 {offsets = [120, 0], sizes = [8, 32], strides = [1, 1]} : vector<128x32xf32> to vector<8x32xf32>
    %c0_110 = arith.constant 0 : index
    %c480 = arith.constant 480 : index
    %179 = vector.load %arg16[%c0_110, %c480] : memref<8x512xf32, #tpu.memory_space<vmem>>, vector<8x32xf32>
    tpu.vector_store %arg16[%c0_110, %c480], %178 {strides = array<i32>} : memref<8x512xf32, #tpu.memory_space<vmem>>, vector<8x32xf32>,
    %c0_111 = arith.constant 0 : index
    %c0_112 = arith.constant 0 : index
    %180 = vector.load %arg16[%c0_111, %c0_112] : memref<8x512xf32, #tpu.memory_space<vmem>>, vector<8x512xf32>
    %181 = arith.truncf %180 : vector<8x512xf32> to vector<8x512xbf16>
    %c0_113 = arith.constant 0 : index
    %c0_114 = arith.constant 0 : index
    %182 = vector.load %arg12[%c0_113, %c0_114] : memref<512x8xbf16, #tpu.memory_space<vmem>>, vector<512x8xbf16>
    %cst_115 = arith.constant dense<0.000000e+00> : vector<8x8xf32>
    %183 = tpu.matmul %181, %182, %cst_115 {dimension_numbers = #tpu.dot_dimension_numbers<[1], [0], [0], [1], [0, 0, 1, 1], [], []>} : vector<8x512xbf16>, vector<512x8xbf16>, vector<8x8xf32> -> vector<8x8xf32>
    %184 = arith.negf %183 : vector<8x8xf32>
    %185 = math.exp %184 : vector<8x8xf32>
    %cst_116 = arith.constant 1.000000e+00 : f32
    %186 = vector.broadcast %cst_116 : f32 to vector<8x8xf32>
    %187 = arith.addf %186, %185 : vector<8x8xf32>
    %188 = arith.divf %186, %187 : vector<8x8xf32>
    %c0_117 = arith.constant 0 : index
    %c0_118 = arith.constant 0 : index
    %189 = vector.load %arg13[%c0_117, %c0_118] : memref<8x8xf32, #tpu.memory_space<vmem>>, vector<8x8xf32>
    tpu.vector_store %arg13[%c0_117, %c0_118], %188 {strides = array<i32>} : memref<8x8xf32, #tpu.memory_space<vmem>>, vector<8x8xf32>,
    return
  }
  func.func @transform_0(%arg0: i32) -> (i32, i32) {
    %c0_i32 = arith.constant 0 : i32
    %c0_i32_0 = arith.constant 0 : i32
    %c0_i32_1 = arith.constant 0 : i32
    return %c0_i32, %c0_i32_0 : i32, i32
  }
  func.func @transform_1(%arg0: i32) -> (i32, i32) {
    %c0_i32 = arith.constant 0 : i32
    %c0_i32_0 = arith.constant 0 : i32
    %c0_i32_1 = arith.constant 0 : i32
    return %c0_i32, %c0_i32_0 : i32, i32
  }
  func.func @transform_2(%arg0: i32) -> (i32, i32) {
    %c0_i32 = arith.constant 0 : i32
    %c0_i32_0 = arith.constant 0 : i32
    %c0_i32_1 = arith.constant 0 : i32
    return %c0_i32, %c0_i32_0 : i32, i32
  }
  func.func @transform_3(%arg0: i32) -> (i32, i32) {
    %c0_i32 = arith.constant 0 : i32
    %c0_i32_0 = arith.constant 0 : i32
    %c0_i32_1 = arith.constant 0 : i32
    return %c0_i32, %c0_i32_0 : i32, i32
  }
  func.func @transform_4(%arg0: i32) -> (i32, i32) {
    %c0_i32 = arith.constant 0 : i32
    %c0_i32_0 = arith.constant 0 : i32
    %c0_i32_1 = arith.constant 0 : i32
    return %c0_i32, %c0_i32_0 : i32, i32
  }
  func.func @transform_5(%arg0: i32) -> (i32, i32) {
    %c0_i32 = arith.constant 0 : i32
    %c0_i32_0 = arith.constant 0 : i32
    %c0_i32_1 = arith.constant 0 : i32
    return %c0_i32, %c0_i32_0 : i32, i32
  }
  func.func @transform_6(%arg0: i32) -> (i32, i32) {
    %c0_i32 = arith.constant 0 : i32
    %c0_i32_0 = arith.constant 0 : i32
    %c0_i32_1 = arith.constant 0 : i32
    return %c0_i32, %c0_i32_0 : i32, i32
  }
  func.func @transform_7(%arg0: i32) -> (i32, i32) {
    %c0_i32 = arith.constant 0 : i32
    %c0_i32_0 = arith.constant 0 : i32
    %c0_i32_1 = arith.constant 0 : i32
    return %c0_i32, %c0_i32_0 : i32, i32
  }
  func.func @transform_8(%arg0: i32) -> (i32, i32) {
    %c0_i32 = arith.constant 0 : i32
    %c0_i32_0 = arith.constant 0 : i32
    %c0_i32_1 = arith.constant 0 : i32
    return %c0_i32, %c0_i32_0 : i32, i32
  }
  func.func @transform_9(%arg0: i32) -> (i32, i32) {
    %c0_i32 = arith.constant 0 : i32
    %c0_i32_0 = arith.constant 0 : i32
    %c0_i32_1 = arith.constant 0 : i32
    return %c0_i32, %c0_i32_0 : i32, i32
  }
  func.func @transform_10(%arg0: i32) -> (i32, i32) {
    %c0_i32 = arith.constant 0 : i32
    %c0_i32_0 = arith.constant 0 : i32
    %c0_i32_1 = arith.constant 0 : i32
    return %c0_i32, %c0_i32_0 : i32, i32
  }
  func.func @transform_11(%arg0: i32) -> (i32, i32) {
    %c0_i32 = arith.constant 0 : i32
    %c0_i32_0 = arith.constant 0 : i32
    %c0_i32_1 = arith.constant 0 : i32
    return %c0_i32, %c0_i32_0 : i32, i32
  }
  func.func @transform_12(%arg0: i32) -> (i32, i32) {
    %c0_i32 = arith.constant 0 : i32
    %c0_i32_0 = arith.constant 0 : i32
    %c0_i32_1 = arith.constant 0 : i32
    return %c0_i32, %c0_i32_0 : i32, i32
  }
}

</mosaic_0001>

<bundles_post_ra>
// kernel: dcgan_critic_forward.1
= control target key start
LH: loop header
LB: loop body
LE: loop exit
PB: predicated region body
PF: predicated region fallthrough
CT: control target
= control target key end

     0   :  { %vm74_vm0 = vcmask 130048   ;;  %s2952_s20 = smov 8   ;;  %s2954_s21 = smov 24   ;;  %s3562_s1 = inlined_call_operand.vmem [shape: bf16[16,8], index: 1, kind: input, shape index: {}]   ;;  %s3563_s0 = inlined_call_operand.vmem [shape: f32[128,16], index: 0, kind: input, shape index: {}]   ;;  %s3564_s2 = inlined_call_operand.vmem [shape: bf16[512,128], index: 2, kind: input, shape index: {}]   ;;  %s3565_s3 = inlined_call_operand.vmem [shape: bf16[128,16], index: 3, kind: input, shape index: {}]   ;;  %s3566_s6 = inlined_call_operand.vmem [shape: bf16[128,32], index: 6, kind: input, shape index: {}]   ;;  %s3567_s4 = inlined_call_operand.vmem [shape: f32[1,16], index: 4, kind: input, shape index: {}]   ;;  %s3568_s5 = inlined_call_operand.vmem [shape: f32[1,16], index: 5, kind: input, shape index: {}]   ;;  %s3569_s7 = inlined_call_operand.vmem [shape: bf16[256,32], index: 7, kind: input, shape index: {}]   ;;  %s3570_s10 = inlined_call_operand.vmem [shape: bf16[128,8], index: 10, kind: input, shape index: {}]   ;;  %s3571_s8 = inlined_call_operand.vmem [shape: f32[1,32], index: 8, kind: input, shape index: {}]   ;;  %s3572_s9 = inlined_call_operand.vmem [shape: f32[1,32], index: 9, kind: input, shape index: {}]   ;;  %s3573_s11 = inlined_call_operand.vmem [shape: bf16[512,8], index: 11, kind: input, shape index: {}]   ;;  %s3574_s12 = inlined_call_operand.vmem [shape: f32[8,8], index: 12, kind: output, shape index: {}]  }
   0x1   :  { %v2839_v0 = vld [vmem:[%s3562_s1] sm:$0xff]   ;;  %v43_v2 = vld [vmem:[%s3563_s0 + $0x8] sm:$0xff]  ;;  %v44_v3 = vld [vmem:[%s3563_s0 + $0x10] sm:$0xff]  ;;  %s2955_s22 = smov 32   ;;  %s2956_s23 = smov 40  }
   0x2   :  { %v42_v1 = vld [vmem:[%s3563_s0] sm:$0xff]  ;;  %2667 = vmatprep.subr.bf16.mxu0 %v2839_v0  ;;  %v45_v5 = vld [vmem:[%s3563_s0 + $0x18] sm:$0xff]  ;;  %v47_v7 = vld [vmem:[%s3563_s0 + $0x28] sm:$0xff]  ;;  %s2957_s24 = smov 48   ;;  %s2958_s25 = smov 56  }
   0x3   :  { %v58_v4 = vpack.c.bf16 %v43_v2, %v42_v1  ;;  %v46_v6 = vld [vmem:[%s3563_s0 + $0x20] sm:$0xff]  ;;  %2668 = vmatpush3.bf16.msra.mxu0 %v2839_v0  ;;  %v59_v8 = vpack.c.bf16 %v45_v5, %v44_v3  ;;  %v48_v10 = vld [vmem:[%s3563_s0 + $0x30] sm:$0xff]  ;;  %v49_v11 = vld [vmem:[%s3563_s0 + $0x38] sm:$0xff]  ;;  %s2959_s26 = smov 64   ;;  %s2960_s27 = smov 72  }
   0x4   :  { %v60_v9 = vpack.c.bf16 %v47_v7, %v46_v6  ;;  %v50_v12 = vld [vmem:[%s3563_s0 + $0x40] sm:$0xff]  ;;  %v51_v13 = vld [vmem:[%s3563_s0 + $0x48] sm:$0xff]  ;;  %v61_v14 = vpack.c.bf16 %v49_v11, %v48_v10  ;;  %v52_v16 = vld [vmem:[%s3563_s0 + $0x50] sm:$0xff]  ;;  %s2961_s28 = smov 80   ;;  %s2962_s29 = smov 88  }
   0x5   :  { %2669 = vmatprep.mubr.msk.bf16.mxu0 %vm74_vm0, %v58_v4  ;;  %v62_v15 = vpack.c.bf16 %v51_v13, %v50_v12  ;;  %v53_v17 = vld [vmem:[%s3563_s0 + $0x58] sm:$0xff]  ;;  %v54_v18 = vld [vmem:[%s3563_s0 + $0x60] sm:$0xff]  ;;  %v55_v19 = vld [vmem:[%s3563_s0 + $0x68] sm:$0xff]  ;;  %s2963_s15 = smov 96   ;;  %s2964_s19 = smov 104  }
   0x6   :  { %2670 = vmatmul.mubr.msk.bf16.vlgmr.msra.gmra.mxu0 %vm74_vm0, %v59_v8  ;;  %v63_v20 = vpack.c.bf16 %v53_v17, %v52_v16  ;;  %v64_v21 = vpack.c.bf16 %v55_v19, %v54_v18  ;;  %v56_v22 = vld [vmem:[%s3563_s0 + $0x70] sm:$0xff]  ;;  %v57_v23 = vld [vmem:[%s3563_s0 + $0x78] sm:$0xff]  ;;  %v2840_v25 = vld [vmem:[%s3564_s2] sm:$0xff]   ;;  %s2966_s14 = smov 120  }
   0x7   :  { %2673 = vmatprep.mubr.msk.bf16.mxu0 %vm74_vm0, %v60_v9  ;;  %v65_v24 = vpack.c.bf16 %v57_v23, %v56_v22  ;;  %2701 = vmatprep.mubr.bf16.mxu1 %v2840_v25  ;;  %v2841_v18 = vld [vmem:[%s3564_s2 + $0x8] sm:$0xff]   ;;  %v2842_v19 = vld [vmem:[%s3564_s2 + $0x10] sm:$0xff]   ;;  %v2848_v25 = vld [vmem:[%s3564_s2 + $0x40] sm:$0xff]  }
   0x8   :  { %v2845_v22 = vld [vmem:[%s3564_s2 + $0x28] sm:$0xff]   ;;  %v2846_v23 = vld [vmem:[%s3564_s2 + $0x30] sm:$0xff]  }
   0xe   :  { %2674 = vmatmul.mubr.msk.bf16.gmra.mxu0 %vm74_vm0, %v61_v14 }
   0xf   :  { %2677 = vmatprep.mubr.msk.bf16.mxu0 %vm74_vm0, %v62_v15 }
  0x16   :  { %2678 = vmatmul.mubr.msk.bf16.gmra.mxu0 %vm74_vm0, %v63_v20  ;;  %v2843_v20 = vld [vmem:[%s3564_s2 + $0x18] sm:$0xff]  }
  0x17   :  { %2681 = vmatprep.mubr.msk.bf16.mxu0 %vm74_vm0, %v64_v21  ;;  %v2844_v21 = vld [vmem:[%s3564_s2 + $0x20] sm:$0xff]  }
  0x1e   :  { %2682 = vmatmul.mubr.msk.bf16.gmra.mxu0 %vm74_vm0, %v65_v24  ;;  %v2847_v24 = vld [vmem:[%s3564_s2 + $0x38] sm:$0xff]  }
  0xc6   :  { %v3094_v26 = vpop.f32.mrf.mxu0 }
  0xc7   :  { %v214_v7 = vmul.f32 0.2, %v3094_v26  ;;  %vm198_vm14 = vcmp.gt.f32.partialorder %v3094_v26, 0.0 }
  0xc8   :  { %v3096_v27 = vpop.f32.mrf.mxu0 }
  0xc9   :  { %v230_v12 = vsel %vm198_vm14, %v3094_v26, %v214_v7  ;;  %v212_v13 = vmul.f32 0.2, %v3096_v27  ;;  %v2849_v26 = vld [vmem:[%s3564_s2 + $0x48] sm:$0xff]   ;;  %vm1049_vm14 = vcmask 851712  }
  0xca   :  { %v3098_v28 = vpop.f32.mrf.mxu0 }
  0xcb   :  { %v215_v5 = vmul.f32 0.2, %v3098_v28  ;;  %vm199_vm13 = vcmp.gt.f32.partialorder %v3098_v28, 0.0 }
  0xcc   :  { %v3100_v29 = vpop.f32.mrf.mxu0 }
  0xcd   :  { %v231_v10 = vsel %vm199_vm13, %v3098_v28, %v215_v5  ;;  %v213_v11 = vmul.f32 0.2, %v3100_v29  ;;  %vm197_vm15 = vcmp.gt.f32.partialorder %v3100_v29, 0.0  ;;  %v2851_v28 = vld [vmem:[%s3564_s2 + $0x58] sm:$0xff]   ;;  %vm1028_vm13 = vcmask 786112  }
  0xce   :  { %v2675_v30 = vpop.f32.mrf.mxu0  ;;  %v309_v14 = vpack.c.bf16 %v231_v10, %v230_v12 }
  0xcf   :  { %v218_v61 = vmul.f32 0.2, %v2675_v30  ;;  %vm202_vm10 = vcmp.gt.f32.partialorder %v2675_v30, 0.0  ;;  %v229_v15 = vsel %vm197_vm15, %v3100_v29, %v213_v11  ;;  %v2852_v29 = vld [vmem:[%s3564_s2 + $0x60] sm:$0xff]   ;;  %vm1070_vm15 = vcmask 917312  }
  0xd0   :  { %v3102_v31 = vpop.f32.mrf.mxu0 }
  0xd1   :  { %v234_v2 = vsel %vm202_vm10, %v2675_v30, %v218_v61  ;;  %v216_v3 = vmul.f32 0.2, %v3102_v31  ;;  %vm200_vm12 = vcmp.gt.f32.partialorder %v3102_v31, 0.0  ;;  %v2853_v30 = vld [vmem:[%s3564_s2 + $0x68] sm:$0xff]   ;;  %vm965_vm10 = vcmask 589312  }
  0xd2   :  { %v2676_v32 = vpop.f32.mrf.mxu0 }
  0xd3   :  { %v219_v59 = vmul.f32 0.2, %v2676_v32  ;;  %vm203_vm9 = vcmp.gt.f32.partialorder %v2676_v32, 0.0  ;;  %v232_v8 = vsel %vm200_vm12, %v3102_v31, %v216_v3  ;;  %v2854_v31 = vld [vmem:[%s3564_s2 + $0x70] sm:$0xff]   ;;  %vm1007_vm12 = vcmask 720512  }
  0xd4   :  { %v152_v33 = vpop.f32.mrf.mxu0 }
  0xd5   :  { %v235_v0 = vsel %vm203_vm9, %v2676_v32, %v219_v59  ;;  %v217_v1 = vmul.f32 0.2, %v152_v33  ;;  %vm201_vm11 = vcmp.gt.f32.partialorder %v152_v33, 0.0  ;;  %v2855_v32 = vld [vmem:[%s3564_s2 + $0x78] sm:$0xff]   ;;  %vm944_vm9 = vcmask 523712  }
  0xd6   :  { %v2679_v34 = vpop.f32.mrf.mxu0  ;;  %v311_v4 = vpack.c.bf16 %v235_v0, %v234_v2 }
  0xd7   :  { %v222_v50 = vmul.f32 0.2, %v2679_v34  ;;  %vm206_vm6 = vcmp.gt.f32.partialorder %v2679_v34, 0.0  ;;  %v233_v6 = vsel %vm201_vm11, %v152_v33, %v217_v1  ;;  %v2856_v33 = vld [vmem:[%s3564_s2 + $0x80] sm:$0xff]   ;;  %vm986_vm11 = vcmask 654912  }
  0xd8   :  { %v165_v35 = vpop.f32.mrf.mxu0  ;;  %v310_v9 = vpack.c.bf16 %v233_v6, %v232_v8 }
  0xd9   :  { %v238_v56 = vsel %vm206_vm6, %v2679_v34, %v222_v50  ;;  %v220_v57 = vmul.f32 0.2, %v165_v35  ;;  %vm204_vm8 = vcmp.gt.f32.partialorder %v165_v35, 0.0  ;;  %v2857_v34 = vld [vmem:[%s3564_s2 + $0x88] sm:$0xff]   ;;  %vm881_vm6 = vcmask 326912  }
  0xda   :  { %v2680_v36 = vpop.f32.mrf.mxu0 }
  0xdb   :  { %v223_v44 = vmul.f32 0.2, %v2680_v36  ;;  %vm207_vm5 = vcmp.gt.f32.partialorder %v2680_v36, 0.0  ;;  %v236_v62 = vsel %vm204_vm8, %v165_v35, %v220_v57  ;;  %v2858_v35 = vld [vmem:[%s3564_s2 + $0x90] sm:$0xff]   ;;  %vm923_vm8 = vcmask 458112  }
  0xdc   :  { %v168_v37 = vpop.f32.mrf.mxu0 }
  0xdd   :  { %v239_v54 = vsel %vm207_vm5, %v2680_v36, %v223_v44  ;;  %v221_v55 = vmul.f32 0.2, %v168_v37  ;;  %vm205_vm7 = vcmp.gt.f32.partialorder %v168_v37, 0.0  ;;  %v2859_v36 = vld [vmem:[%s3564_s2 + $0x98] sm:$0xff]   ;;  %vm860_vm5 = vcmask 261312  }
  0xde   :  { %v2683_v38 = vpop.f32.mrf.mxu0  ;;  %v313_v58 = vpack.c.bf16 %v239_v54, %v238_v56  ;;  %v2867_v44 = vld [vmem:[%s3564_s2 + $0xd8] sm:$0xff]  }
  0xdf   :  { %v226_v40 = vmul.f32 0.2, %v2683_v38  ;;  %vm210_vm1 = vcmp.gt.f32.partialorder %v2683_v38, 0.0  ;;  %v237_v60 = vsel %vm205_vm7, %v168_v37, %v221_v55  ;;  %v2860_v37 = vld [vmem:[%s3564_s2 + $0xa0] sm:$0xff]   ;;  %vm902_vm7 = vcmask 392512  }
  0xe0   :  { %v181_v39 = vpop.f32.mrf.mxu0  ;;  %v312_v63 = vpack.c.bf16 %v237_v60, %v236_v62 }
  0xe1   :  { %v224_v42 = vmul.f32 0.2, %v181_v39  ;;  %vm208_vm3 = vcmp.gt.f32.partialorder %v181_v39, 0.0  ;;  %v242_v47 = vsel %vm210_vm1, %v2683_v38, %v226_v40  ;;  %vm196_vm1 = vcmp.gt.f32.partialorder %v3096_v27, 0.0  ;;  %v2861_v38 = vld [vmem:[%s3564_s2 + $0xa8] sm:$0xff]   ;;  %v2863_v40 = vld [vmem:[%s3564_s2 + $0xb8] sm:$0xff]  }
  0xe2   :  { %v2684_v41 = vpop.f32.mrf.mxu0  ;;  %v228_v16 = vsel %vm196_vm1, %v3096_v27, %v212_v13  ;;  %v2850_v27 = vld [vmem:[%s3564_s2 + $0x50] sm:$0xff]   ;;  %vm1091_vm1 = vcmask 982912  }
  0xe3   :  { %vm211_vm2 = vcmp.gt.f32.partialorder %v2684_v41, 0.0  ;;  %v227_v43 = vmul.f32 0.2, %v2684_v41  ;;  %v240_v51 = vsel %vm208_vm3, %v181_v39, %v224_v42  ;;  %v308_v17 = vpack.c.bf16 %v229_v15, %v228_v16  ;;  %v2862_v39 = vld [vmem:[%s3564_s2 + $0xb0] sm:$0xff]   ;;  %v2865_v42 = vld [vmem:[%s3564_s2 + $0xc8] sm:$0xff]  }
  0xe4   :  { %v184_v45 = vpop.f32.mrf.mxu0  ;;  %vm818_vm3 = vcmask 130112  }
  0xe5   :  { %vm209_vm4 = vcmp.gt.f32.partialorder %v184_v45, 0.0  ;;  %v225_v46 = vmul.f32 0.2, %v184_v45  ;;  %v243_v48 = vsel %vm211_vm2, %v2684_v41, %v227_v43  ;;  %v2864_v41 = vld [vmem:[%s3564_s2 + $0xc0] sm:$0xff]   ;;  %v2866_v43 = vld [vmem:[%s3564_s2 + $0xd0] sm:$0xff]   ;;  %vm797_vm2 = vcmask 64512  }
  0xe6   :  { %v315_v49 = vpack.c.bf16 %v243_v48, %v242_v47  ;;  %v2870_v47 = vld [vmem:[%s3564_s2 + $0xf0] sm:$0xff]   ;;  %v2871_v48 = vld [vmem:[%s3564_s2 + $0xf8] sm:$0xff]  }
  0xe7   :  { %v241_v52 = vsel %vm209_vm4, %v184_v45, %v225_v46  ;;  %v2868_v45 = vld [vmem:[%s3564_s2 + $0xe0] sm:$0xff]   ;;  %v2869_v46 = vld [vmem:[%s3564_s2 + $0xe8] sm:$0xff]   ;;  %s2953_s2 = smov 16   ;;  %vm839_vm4 = vcmask 195712  }
  0xe8   :  { %2685 = vmatprep.subr.bf16.mxu1 %v315_v49  ;;  %v314_v53 = vpack.c.bf16 %v241_v52, %v240_v51 }
  0xe9   :  { %2686 = vmatpush3.bf16.msra.mxu1 %v315_v49 }
  0xea   :  { %2687 = vmatprep.subr.bf16.mxu1 %v314_v53 }
  0xed   :  { %2688 = vmatpush3.bf16.msra.mxu1 %v314_v53 }
  0xee   :  { %2689 = vmatprep.subr.bf16.mxu1 %v313_v58 }
  0xf1   :  { %2690 = vmatpush3.bf16.msra.mxu1 %v313_v58 }
  0xf2   :  { %2691 = vmatprep.subr.bf16.mxu1 %v312_v63 }
  0xf5   :  { %2692 = vmatpush3.bf16.msra.mxu1 %v312_v63 }
  0xf6   :  { %2693 = vmatprep.subr.bf16.mxu1 %v311_v4 }
  0xf9   :  { %2694 = vmatpush3.bf16.msra.mxu1 %v311_v4 }
  0xfa   :  { %2695 = vmatprep.subr.bf16.mxu1 %v310_v9 }
  0xfd   :  { %2696 = vmatpush3.bf16.msra.mxu1 %v310_v9 }
  0xfe   :  { %2697 = vmatprep.subr.bf16.mxu1 %v309_v14 }
 0x101   :  { %2698 = vmatpush3.bf16.msra.mxu1 %v309_v14 }
 0x102   :  { %2699 = vmatprep.subr.bf16.mxu1 %v308_v17 }
 0x105   :  { %2700 = vmatpush3.bf16.msra.mxu1 %v308_v17 }
 0x108   :  { %2702 = vmatmul.mubr.bf16.vlgmr.msra.gmra.mxu1 %v2841_v18 }
 0x109   :  { %2705 = vmatprep.mubr.bf16.mxu1 %v2842_v19 }
 0x110   :  { %2706 = vmatmul.mubr.bf16.gmra.mxu1 %v2843_v20 }
 0x111   :  { %2709 = vmatprep.mubr.bf16.mxu1 %v2844_v21 }
 0x118   :  { %2710 = vmatmul.mubr.bf16.gmra.mxu1 %v2845_v22 }
 0x119   :  { %2713 = vmatprep.mubr.bf16.mxu1 %v2846_v23 }
 0x120   :  { %2714 = vmatmul.mubr.bf16.gmra.mxu1 %v2847_v24 }
 0x121   :  { %2717 = vmatprep.mubr.bf16.mxu1 %v2848_v25 }
 0x128   :  { %2718 = vmatmul.mubr.bf16.gmra.mxu1 %v2849_v26 }
 0x129   :  { %2721 = vmatprep.mubr.bf16.mxu1 %v2850_v27 }
 0x130   :  { %2722 = vmatmul.mubr.bf16.gmra.mxu1 %v2851_v28 }
 0x131   :  { %2725 = vmatprep.mubr.bf16.mxu1 %v2852_v29 }
 0x138   :  { %2726 = vmatmul.mubr.bf16.gmra.mxu1 %v2853_v30 }
 0x139   :  { %2729 = vmatprep.mubr.bf16.mxu1 %v2854_v31 }
 0x140   :  { %2730 = vmatmul.mubr.bf16.gmra.mxu1 %v2855_v32 }
 0x141   :  { %2733 = vmatprep.mubr.bf16.mxu1 %v2856_v33  ;;  %v2872_v33 = vld [vmem:[%s3565_s3 + $0x38] sm:$0xff]  }
 0x142   :  { %2765 = vmatprep.subr.bf16.mxu0 %v2872_v33 }
 0x143   :  { %2766 = vmatpush3.bf16.msra.mxu0 %v2872_v33 }
 0x148   :  { %2734 = vmatmul.mubr.bf16.gmra.mxu1 %v2857_v34 }
 0x149   :  { %2737 = vmatprep.mubr.bf16.mxu1 %v2858_v35 }
 0x150   :  { %2738 = vmatmul.mubr.bf16.gmra.mxu1 %v2859_v36  ;;  %v2873_v36 = vld [vmem:[%s3565_s3 + $0x30] sm:$0xff]  }
 0x151   :  { %2741 = vmatprep.mubr.bf16.mxu1 %v2860_v37  ;;  %2767 = vmatprep.subr.bf16.mxu0 %v2873_v36 }
 0x152   :  { %2768 = vmatpush3.bf16.msra.mxu0 %v2873_v36 }
 0x158   :  { %2742 = vmatmul.mubr.bf16.gmra.mxu1 %v2861_v38 }
 0x159   :  { %2745 = vmatprep.mubr.bf16.mxu1 %v2862_v39  ;;  %v2874_v39 = vld [vmem:[%s3565_s3 + $0x28] sm:$0xff]  }
 0x15a   :  { %2769 = vmatprep.subr.bf16.mxu0 %v2874_v39 }
 0x15b   :  { %2770 = vmatpush3.bf16.msra.mxu0 %v2874_v39 }
 0x160   :  { %2746 = vmatmul.mubr.bf16.gmra.mxu1 %v2863_v40 }
 0x161   :  { %2749 = vmatprep.mubr.bf16.mxu1 %v2864_v41 }
 0x168   :  { %2750 = vmatmul.mubr.bf16.gmra.mxu1 %v2865_v42  ;;  %v2875_v42 = vld [vmem:[%s3565_s3 + $0x20] sm:$0xff]  }
 0x169   :  { %2753 = vmatprep.mubr.bf16.mxu1 %v2866_v43  ;;  %2771 = vmatprep.subr.bf16.mxu0 %v2875_v42 }
 0x16a   :  { %2772 = vmatpush3.bf16.msra.mxu0 %v2875_v42 }
 0x170   :  { %2754 = vmatmul.mubr.bf16.gmra.mxu1 %v2867_v44 }
 0x171   :  { %2757 = vmatprep.mubr.bf16.mxu1 %v2868_v45  ;;  %v2876_v45 = vld [vmem:[%s3565_s3 + $0x18] sm:$0xff]  }
 0x172   :  { %2773 = vmatprep.subr.bf16.mxu0 %v2876_v45 }
 0x173   :  { %2774 = vmatpush3.bf16.msra.mxu0 %v2876_v45 }
 0x178   :  { %2758 = vmatmul.mubr.bf16.gmra.mxu1 %v2869_v46 }
 0x179   :  { %2761 = vmatprep.mubr.bf16.mxu1 %v2870_v47 }
 0x180   :  { %2762 = vmatmul.mubr.bf16.gmra.mxu1 %v2871_v48  ;;  %v2877_v48 = vld [vmem:[%s3565_s3 + $0x10] sm:$0xff]  }
 0x181   :  { %2775 = vmatprep.subr.bf16.mxu0 %v2877_v48 }
 0x182   :  { %2776 = vmatpush3.bf16.msra.mxu0 %v2877_v48 }
 0x1c8   :  { %v2703_v49 = vpop.f32.mrf.mxu1 }
 0x1c9   :  { %800 = vst.msk [vmem:[#allocation2 + $0x10] sm:$0xff] %vm797_vm2, %v2703_v49 }
 0x1ca   :  { %v542_v50 = vpop.f32.mrf.mxu1 }
 0x1cb   :  { %798 = vst.msk [vmem:[#allocation2] sm:$0xff] %vm797_vm2, %v542_v50 }
 0x1cc   :  { %v2704_v51 = vpop.f32.mrf.mxu1 }
 0x1cd   :  { %801 = vst.msk [vmem:[#allocation2 + $0x18] sm:$0xff] %vm797_vm2, %v2704_v51  ;;  %v2878_v51 = vld [vmem:[%s3565_s3 + $0x8] sm:$0xff]  }
 0x1ce   :  { %v545_v52 = vpop.f32.mrf.mxu1  ;;  %2777 = vmatprep.subr.bf16.mxu0 %v2878_v51 }
 0x1cf   :  { %799 = vst.msk [vmem:[#allocation2 + $0x8] sm:$0xff] %vm797_vm2, %v545_v52  ;;  %v2879_v52 = vld [vmem:[%s3565_s3] sm:$0xff]   ;;  %2778 = vmatpush3.bf16.msra.mxu0 %v2878_v51 }
 0x1d0   :  { %v2707_v53 = vpop.f32.mrf.mxu1  ;;  %2779 = vmatprep.subr.bf16.mxu0 %v2879_v52 }
 0x1d1   :  { %810 = vrot.lane.b32.xlu1 %v2707_v53, %s2952_s20 }
 0x1d2   :  { %v558_v54 = vpop.f32.mrf.mxu1 }
 0x1d3   :  { %806 = vrot.lane.b32.xlu0 %v558_v54, %s2952_s20  ;;  %2780 = vmatpush3.bf16.msra.mxu0 %v2879_v52 }
 0x1d4   :  { %v2708_v55 = vpop.f32.mrf.mxu1 }
 0x1d5   :  { %812 = vrot.lane.b32.xlu1 %v2708_v55, %s2952_s20 }
 0x1d6   :  { %v561_v56 = vpop.f32.mrf.mxu1 }
 0x1d7   :  { %808 = vrot.lane.b32.xlu0 %v561_v56, %s2952_s20 }
 0x1d8   :  { %v2711_v57 = vpop.f32.mrf.mxu1 }
 0x1da   :  { %v574_v58 = vpop.f32.mrf.mxu1 }
 0x1db   :  { %831 = vrot.lane.b32.xlu0 %v2711_v57, %s2953_s2 }
 0x1dc   :  { %v2712_v59 = vpop.f32.mrf.mxu1 }
 0x1dd   :  { %833 = vrot.lane.b32.xlu1 %v2712_v59, %s2953_s2 }
 0x1de   :  { %v577_v60 = vpop.f32.mrf.mxu1 }
 0x1df   :  { %827 = vrot.lane.b32.xlu0 %v574_v58, %s2953_s2 }
 0x1e0   :  { %v2715_v61 = vpop.f32.mrf.mxu1 }
 0x1e1   :  { %829 = vrot.lane.b32.xlu1 %v577_v60, %s2953_s2 }
 0x1e2   :  { %v590_v62 = vpop.f32.mrf.mxu1 }
 0x1e3   :  { %852 = vrot.lane.b32.xlu0 %v2715_v61, %s2954_s21 }
 0x1e4   :  { %v2716_v63 = vpop.f32.mrf.mxu1 }
 0x1e5   :  { %854 = vrot.lane.b32.xlu1 %v2716_v63, %s2954_s21 }
 0x1e6   :  { %v593_v0 = vpop.f32.mrf.mxu1 }
 0x1e7   :  { %848 = vrot.lane.b32.xlu0 %v590_v62, %s2954_s21 }
 0x1e8   :  { %v2719_v1 = vpop.f32.mrf.mxu1 }
 0x1e9   :  { %850 = vrot.lane.b32.xlu1 %v593_v0, %s2954_s21 }
 0x1ea   :  { %v606_v2 = vpop.f32.mrf.mxu1 }
 0x1eb   :  { %873 = vrot.lane.b32.xlu0 %v2719_v1, %s2955_s22 }
 0x1ec   :  { %v2720_v3 = vpop.f32.mrf.mxu1 }
 0x1ed   :  { %875 = vrot.lane.b32.xlu1 %v2720_v3, %s2955_s22 }
 0x1ee   :  { %v609_v4 = vpop.f32.mrf.mxu1 }
 0x1ef   :  { %869 = vrot.lane.b32.xlu0 %v606_v2, %s2955_s22 }
 0x1f0   :  { %v2723_v5 = vpop.f32.mrf.mxu1 }
 0x1f1   :  { %871 = vrot.lane.b32.xlu1 %v609_v4, %s2955_s22 }
 0x1f2   :  { %v622_v6 = vpop.f32.mrf.mxu1 }
 0x1f3   :  { %894 = vrot.lane.b32.xlu0 %v2723_v5, %s2956_s23 }
 0x1f4   :  { %v2724_v7 = vpop.f32.mrf.mxu1 }
 0x1f5   :  { %896 = vrot.lane.b32.xlu1 %v2724_v7, %s2956_s23 }
 0x1f6   :  { %v625_v8 = vpop.f32.mrf.mxu1 }
 0x1f7   :  { %890 = vrot.lane.b32.xlu0 %v622_v6, %s2956_s23 }
 0x1f8   :  { %v2727_v9 = vpop.f32.mrf.mxu1 }
 0x1f9   :  { %892 = vrot.lane.b32.xlu1 %v625_v8, %s2956_s23 }
 0x1fa   :  { %v638_v10 = vpop.f32.mrf.mxu1 }
 0x1fb   :  { %915 = vrot.lane.b32.xlu0 %v2727_v9, %s2957_s24 }
 0x1fc   :  { %v2728_v11 = vpop.f32.mrf.mxu1 }
 0x1fd   :  { %917 = vrot.lane.b32.xlu1 %v2728_v11, %s2957_s24 }
 0x1fe   :  { %v641_v12 = vpop.f32.mrf.mxu1 }
 0x1ff   :  { %911 = vrot.lane.b32.xlu0 %v638_v10, %s2957_s24 }
 0x200   :  { %v2731_v13 = vpop.f32.mrf.mxu1 }
 0x201   :  { %913 = vrot.lane.b32.xlu1 %v641_v12, %s2957_s24 }
 0x202   :  { %v654_v14 = vpop.f32.mrf.mxu1 }
 0x203   :  { %936 = vrot.lane.b32.xlu0 %v2731_v13, %s2958_s25 }
 0x204   :  { %v2732_v15 = vpop.f32.mrf.mxu1 }
 0x205   :  { %938 = vrot.lane.b32.xlu1 %v2732_v15, %s2958_s25 }
 0x206   :  { %v657_v16 = vpop.f32.mrf.mxu1 }
 0x207   :  { %932 = vrot.lane.b32.xlu0 %v654_v14, %s2958_s25 }
 0x208   :  { %v2735_v17 = vpop.f32.mrf.mxu1 }
 0x209   :  { %934 = vrot.lane.b32.xlu1 %v657_v16, %s2958_s25 }
 0x20a   :  { %v670_v18 = vpop.f32.mrf.mxu1 }
 0x20b   :  { %957 = vrot.lane.b32.xlu0 %v2735_v17, %s2959_s26 }
 0x20c   :  { %v2736_v19 = vpop.f32.mrf.mxu1 }
 0x20d   :  { %959 = vrot.lane.b32.xlu1 %v2736_v19, %s2959_s26 }
 0x20e   :  { %v673_v20 = vpop.f32.mrf.mxu1 }
 0x20f   :  { %953 = vrot.lane.b32.xlu0 %v670_v18, %s2959_s26 }
 0x210   :  { %v2739_v21 = vpop.f32.mrf.mxu1 }
 0x211   :  { %955 = vrot.lane.b32.xlu1 %v673_v20, %s2959_s26 }
 0x212   :  { %v686_v22 = vpop.f32.mrf.mxu1 }
 0x213   :  { %978 = vrot.lane.b32.xlu0 %v2739_v21, %s2960_s27 }
 0x214   :  { %v2740_v23 = vpop.f32.mrf.mxu1 }
 0x215   :  { %980 = vrot.lane.b32.xlu1 %v2740_v23, %s2960_s27 }
 0x216   :  { %v689_v24 = vpop.f32.mrf.mxu1 }
 0x217   :  { %974 = vrot.lane.b32.xlu0 %v686_v22, %s2960_s27 }
 0x218   :  { %v2743_v25 = vpop.f32.mrf.mxu1 }
 0x219   :  { %976 = vrot.lane.b32.xlu1 %v689_v24, %s2960_s27  ;;  %s2965_s27 = smov 112  }
 0x21a   :  { %v702_v26 = vpop.f32.mrf.mxu1 }
 0x21b   :  { %999 = vrot.lane.b32.xlu0 %v2743_v25, %s2961_s28 }
 0x21c   :  { %v2744_v27 = vpop.f32.mrf.mxu1 }
 0x21d   :  { %1001 = vrot.lane.b32.xlu1 %v2744_v27, %s2961_s28 }
 0x21e   :  { %v705_v28 = vpop.f32.mrf.mxu1 }
 0x21f   :  { %995 = vrot.lane.b32.xlu0 %v702_v26, %s2961_s28 }
 0x220   :  { %v2747_v29 = vpop.f32.mrf.mxu1 }
 0x221   :  { %997 = vrot.lane.b32.xlu1 %v705_v28, %s2961_s28 }
 0x222   :  { %v718_v30 = vpop.f32.mrf.mxu1 }
 0x223   :  { %1020 = vrot.lane.b32.xlu0 %v2747_v29, %s2962_s29 }
 0x224   :  { %v2748_v31 = vpop.f32.mrf.mxu1 }
 0x225   :  { %1022 = vrot.lane.b32.xlu1 %v2748_v31, %s2962_s29 }
 0x226   :  { %v721_v32 = vpop.f32.mrf.mxu1 }
 0x227   :  { %1016 = vrot.lane.b32.xlu0 %v718_v30, %s2962_s29 }
 0x228   :  { %v2751_v34 = vpop.f32.mrf.mxu1 }
 0x229   :  { %1018 = vrot.lane.b32.xlu1 %v721_v32, %s2962_s29 }
 0x22a   :  { %v734_v35 = vpop.f32.mrf.mxu1 }
 0x22b   :  { %1041 = vrot.lane.b32.xlu0 %v2751_v34, %s2963_s15 }
 0x22c   :  { %v2752_v37 = vpop.f32.mrf.mxu1 }
 0x22d   :  { %1043 = vrot.lane.b32.xlu1 %v2752_v37, %s2963_s15 }
 0x22e   :  { %v737_v38 = vpop.f32.mrf.mxu1 }
 0x22f   :  { %1037 = vrot.lane.b32.xlu0 %v734_v35, %s2963_s15 }
 0x230   :  { %v2755_v40 = vpop.f32.mrf.mxu1 }
 0x231   :  { %1039 = vrot.lane.b32.xlu1 %v737_v38, %s2963_s15 }
 0x232   :  { %v750_v41 = vpop.f32.mrf.mxu1 }
 0x233   :  { %1062 = vrot.lane.b32.xlu0 %v2755_v40, %s2964_s19 }
 0x234   :  { %v2756_v43 = vpop.f32.mrf.mxu1 }
 0x235   :  { %1064 = vrot.lane.b32.xlu1 %v2756_v43, %s2964_s19 }
 0x236   :  { %v753_v44 = vpop.f32.mrf.mxu1 }
 0x237   :  { %1058 = vrot.lane.b32.xlu0 %v750_v41, %s2964_s19 }
 0x238   :  { %v2759_v46 = vpop.f32.mrf.mxu1 }
 0x239   :  { %1060 = vrot.lane.b32.xlu1 %v753_v44, %s2964_s19 }
 0x23a   :  { %v766_v47 = vpop.f32.mrf.mxu1 }
 0x23b   :  { %1083 = vrot.lane.b32.xlu0 %v2759_v46, %s2965_s27 }
 0x23c   :  { %v2760_v49 = vpop.f32.mrf.mxu1 }
 0x23d   :  { %1085 = vrot.lane.b32.xlu1 %v2760_v49, %s2965_s27 }
 0x23e   :  { %v769_v50 = vpop.f32.mrf.mxu1 }
 0x23f   :  { %1079 = vrot.lane.b32.xlu0 %v766_v47, %s2965_s27 }
 0x240   :  { %v2763_v53 = vpop.f32.mrf.mxu1 }
 0x241   :  { %1081 = vrot.lane.b32.xlu1 %v769_v50, %s2965_s27 }
 0x242   :  { %v782_v54 = vpop.f32.mrf.mxu1 }
 0x243   :  { %v811_v55 = vpop.permute.xlu1 %810  ;;  %1100 = vrot.lane.b32.xlu0 %v782_v54, %s2966_s14 }
 0x244   :  { %821 = vst.msk [vmem:[#allocation2 + $0x10] sm:$0xff] %vm818_vm3, %v811_v55  ;;  %v2764_v56 = vpop.f32.mrf.mxu1 }
 0x245   :  { %v807_v57 = vpop.permute.xlu0 %806 }
 0x246   :  { %819 = vst.msk [vmem:[#allocation2] sm:$0xff] %vm818_vm3, %v807_v57  ;;  %v785_v58 = vpop.f32.mrf.mxu1 }
 0x247   :  { %v813_v59 = vpop.permute.xlu1 %812  ;;  %1104 = vrot.lane.b32.xlu0 %v2763_v53, %s2966_s14  ;;  %1102 = vrot.lane.b32.xlu1 %v785_v58, %s2966_s14 }
 0x248   :  { %822 = vst.msk [vmem:[#allocation2 + $0x18] sm:$0xff] %vm818_vm3, %v813_v59  ;;  %v2880_v59 = vld [vmem:[%s3566_s6] sm:$0xff]  }
 0x249   :  { %v809_v60 = vpop.permute.xlu0 %808 }
 0x24a   :  { %820 = vst.msk [vmem:[#allocation2 + $0x8] sm:$0xff] %vm818_vm3, %v809_v60  ;;  %vm1112_vm3 = vcmask 1048512  }
 0x24b   :  { %1106 = vrot.lane.b32.xlu1 %v2764_v56, %s2966_s14 }
 0x24d   :  { %v832_v61 = vpop.permute.xlu0 %831 }
 0x24e   :  { %842 = vst.msk [vmem:[#allocation2 + $0x10] sm:$0xff] %vm839_vm4, %v832_v61 }
 0x24f   :  { %v834_v62 = vpop.permute.xlu1 %833 }
 0x250   :  { %843 = vst.msk [vmem:[#allocation2 + $0x18] sm:$0xff] %vm839_vm4, %v834_v62 }
 0x251   :  { %v828_v63 = vpop.permute.xlu0 %827 }
 0x252   :  { %840 = vst.msk [vmem:[#allocation2] sm:$0xff] %vm839_vm4, %v828_v63 }
 0x253   :  { %v830_v0 = vpop.permute.xlu1 %829 }
 0x254   :  { %841 = vst.msk [vmem:[#allocation2 + $0x8] sm:$0xff] %vm839_vm4, %v830_v0  ;;  %vm1371_vm4 = vcmask 261120  }
 0x255   :  { %v853_v1 = vpop.permute.xlu0 %852 }
 0x256   :  { %863 = vst.msk [vmem:[#allocation2 + $0x10] sm:$0xff] %vm860_vm5, %v853_v1 }
 0x257   :  { %v855_v2 = vpop.permute.xlu1 %854 }
 0x258   :  { %864 = vst.msk [vmem:[#allocation2 + $0x18] sm:$0xff] %vm860_vm5, %v855_v2 }
 0x259   :  { %v849_v3 = vpop.permute.xlu0 %848 }
 0x25a   :  { %861 = vst.msk [vmem:[#allocation2] sm:$0xff] %vm860_vm5, %v849_v3 }
 0x25b   :  { %v851_v4 = vpop.permute.xlu1 %850 }
 0x25c   :  { %862 = vst.msk [vmem:[#allocation2 + $0x8] sm:$0xff] %vm860_vm5, %v851_v4 }
 0x25d   :  { %v874_v5 = vpop.permute.xlu0 %873 }
 0x25e   :  { %884 = vst.msk [vmem:[#allocation2 + $0x10] sm:$0xff] %vm881_vm6, %v874_v5 }
 0x25f   :  { %v876_v6 = vpop.permute.xlu1 %875 }
 0x260   :  { %885 = vst.msk [vmem:[#allocation2 + $0x18] sm:$0xff] %vm881_vm6, %v876_v6 }
 0x261   :  { %v870_v7 = vpop.permute.xlu0 %869 }
 0x262   :  { %882 = vst.msk [vmem:[#allocation2] sm:$0xff] %vm881_vm6, %v870_v7 }
 0x263   :  { %v872_v8 = vpop.permute.xlu1 %871 }
 0x264   :  { %883 = vst.msk [vmem:[#allocation2 + $0x8] sm:$0xff] %vm881_vm6, %v872_v8 }
 0x265   :  { %v895_v9 = vpop.permute.xlu0 %894 }
 0x266   :  { %905 = vst.msk [vmem:[#allocation2 + $0x10] sm:$0xff] %vm902_vm7, %v895_v9 }
 0x267   :  { %v897_v10 = vpop.permute.xlu1 %896 }
 0x268   :  { %906 = vst.msk [vmem:[#allocation2 + $0x18] sm:$0xff] %vm902_vm7, %v897_v10 }
 0x269   :  { %v891_v11 = vpop.permute.xlu0 %890 }
 0x26a   :  { %903 = vst.msk [vmem:[#allocation2] sm:$0xff] %vm902_vm7, %v891_v11 }
 0x26b   :  { %v893_v12 = vpop.permute.xlu1 %892 }
 0x26c   :  { %904 = vst.msk [vmem:[#allocation2 + $0x8] sm:$0xff] %vm902_vm7, %v893_v12 }
 0x26d   :  { %v916_v13 = vpop.permute.xlu0 %915 }
 0x26e   :  { %926 = vst.msk [vmem:[#allocation2 + $0x10] sm:$0xff] %vm923_vm8, %v916_v13 }
 0x26f   :  { %v918_v14 = vpop.permute.xlu1 %917 }
 0x270   :  { %927 = vst.msk [vmem:[#allocation2 + $0x18] sm:$0xff] %vm923_vm8, %v918_v14 }
 0x271   :  { %v912_v15 = vpop.permute.xlu0 %911 }
 0x272   :  { %924 = vst.msk [vmem:[#allocation2] sm:$0xff] %vm923_vm8, %v912_v15 }
 0x273   :  { %v914_v16 = vpop.permute.xlu1 %913 }
 0x274   :  { %925 = vst.msk [vmem:[#allocation2 + $0x8] sm:$0xff] %vm923_vm8, %v914_v16 }
 0x275   :  { %v937_v17 = vpop.permute.xlu0 %936 }
 0x276   :  { %947 = vst.msk [vmem:[#allocation2 + $0x10] sm:$0xff] %vm944_vm9, %v937_v17 }
 0x277   :  { %v939_v18 = vpop.permute.xlu1 %938 }
 0x278   :  { %948 = vst.msk [vmem:[#allocation2 + $0x18] sm:$0xff] %vm944_vm9, %v939_v18 }
 0x279   :  { %v933_v19 = vpop.permute.xlu0 %932 }
 0x27a   :  { %945 = vst.msk [vmem:[#allocation2] sm:$0xff] %vm944_vm9, %v933_v19 }
 0x27b   :  { %v935_v20 = vpop.permute.xlu1 %934 }
 0x27c   :  { %946 = vst.msk [vmem:[#allocation2 + $0x8] sm:$0xff] %vm944_vm9, %v935_v20  ;;  %vm1504_vm9 = vcmask 392448  }
 0x27d   :  { %v958_v21 = vpop.permute.xlu0 %957 }
 0x27e   :  { %968 = vst.msk [vmem:[#allocation2 + $0x10] sm:$0xff] %vm965_vm10, %v958_v21 }
 0x27f   :  { %v960_v22 = vpop.permute.xlu1 %959 }
 0x280   :  { %969 = vst.msk [vmem:[#allocation2 + $0x18] sm:$0xff] %vm965_vm10, %v960_v22 }
 0x281   :  { %v954_v23 = vpop.permute.xlu0 %953 }
 0x282   :  { %966 = vst.msk [vmem:[#allocation2] sm:$0xff] %vm965_vm10, %v954_v23 }
 0x283   :  { %v956_v24 = vpop.permute.xlu1 %955 }
 0x284   :  { %967 = vst.msk [vmem:[#allocation2 + $0x8] sm:$0xff] %vm965_vm10, %v956_v24  ;;  %vm1510_vm10 = vcmask 523648  }
 0x285   :  { %v979_v25 = vpop.permute.xlu0 %978 }
 0x286   :  { %989 = vst.msk [vmem:[#allocation2 + $0x10] sm:$0xff] %vm986_vm11, %v979_v25 }
 0x287   :  { %v981_v26 = vpop.permute.xlu1 %980 }
 0x288   :  { %990 = vst.msk [vmem:[#allocation2 + $0x18] sm:$0xff] %vm986_vm11, %v981_v26 }
 0x289   :  { %v975_v27 = vpop.permute.xlu0 %974 }
 0x28a   :  { %987 = vst.msk [vmem:[#allocation2] sm:$0xff] %vm986_vm11, %v975_v27 }
 0x28b   :  { %v977_v28 = vpop.permute.xlu1 %976 }
 0x28c   :  { %988 = vst.msk [vmem:[#allocation2 + $0x8] sm:$0xff] %vm986_vm11, %v977_v28  ;;  %vm1516_vm11 = vcmask 654848  }
 0x28d   :  { %v1000_v29 = vpop.permute.xlu0 %999 }
 0x28e   :  { %1010 = vst.msk [vmem:[#allocation2 + $0x10] sm:$0xff] %vm1007_vm12, %v1000_v29 }
 0x28f   :  { %v1002_v30 = vpop.permute.xlu1 %1001 }
 0x290   :  { %1011 = vst.msk [vmem:[#allocation2 + $0x18] sm:$0xff] %vm1007_vm12, %v1002_v30 }
 0x291   :  { %v996_v31 = vpop.permute.xlu0 %995 }
 0x292   :  { %1008 = vst.msk [vmem:[#allocation2] sm:$0xff] %vm1007_vm12, %v996_v31 }
 0x293   :  { %v998_v32 = vpop.permute.xlu1 %997 }
 0x294   :  { %1009 = vst.msk [vmem:[#allocation2 + $0x8] sm:$0xff] %vm1007_vm12, %v998_v32  ;;  %vm1522_vm12 = vcmask 786048  }
 0x295   :  { %v1021_v33 = vpop.permute.xlu0 %1020 }
 0x296   :  { %1031 = vst.msk [vmem:[#allocation2 + $0x10] sm:$0xff] %vm1028_vm13, %v1021_v33 }
 0x297   :  { %v1023_v34 = vpop.permute.xlu1 %1022 }
 0x298   :  { %1032 = vst.msk [vmem:[#allocation2 + $0x18] sm:$0xff] %vm1028_vm13, %v1023_v34 }
 0x299   :  { %v1017_v35 = vpop.permute.xlu0 %1016 }
 0x29a   :  { %1029 = vst.msk [vmem:[#allocation2] sm:$0xff] %vm1028_vm13, %v1017_v35 }
 0x29b   :  { %v1019_v36 = vpop.permute.xlu1 %1018 }
 0x29c   :  { %1030 = vst.msk [vmem:[#allocation2 + $0x8] sm:$0xff] %vm1028_vm13, %v1019_v36  ;;  %vm1528_vm13 = vcmask 917248  }
 0x29d   :  { %v1042_v37 = vpop.permute.xlu0 %1041 }
 0x29e   :  { %1052 = vst.msk [vmem:[#allocation2 + $0x10] sm:$0xff] %vm1049_vm14, %v1042_v37 }
 0x29f   :  { %v1044_v38 = vpop.permute.xlu1 %1043 }
 0x2a0   :  { %1053 = vst.msk [vmem:[#allocation2 + $0x18] sm:$0xff] %vm1049_vm14, %v1044_v38  ;;  %v2438_v38 = vld [vmem:[%s3567_s4] ss:$0 sm:$0xff] }
 0x2a1   :  { %v1038_v39 = vpop.permute.xlu0 %1037 }
 0x2a2   :  { %1050 = vst.msk [vmem:[#allocation2] sm:$0xff] %vm1049_vm14, %v1038_v39 }
 0x2a3   :  { %v1040_v40 = vpop.permute.xlu1 %1039 }
 0x2a4   :  { %1051 = vst.msk [vmem:[#allocation2 + $0x8] sm:$0xff] %vm1049_vm14, %v1040_v40  ;;  %vm1534_vm14 = vcmask 1048448  }
 0x2a5   :  { %v1063_v41 = vpop.permute.xlu0 %1062 }
 0x2a6   :  { %1073 = vst.msk [vmem:[#allocation2 + $0x10] sm:$0xff] %vm1070_vm15, %v1063_v41 }
 0x2a7   :  { %v1065_v42 = vpop.permute.xlu1 %1064 }
 0x2a8   :  { %1074 = vst.msk [vmem:[#allocation2 + $0x18] sm:$0xff] %vm1070_vm15, %v1065_v42 }
 0x2a9   :  { %v1059_v43 = vpop.permute.xlu0 %1058 }
 0x2aa   :  { %1071 = vst.msk [vmem:[#allocation2] sm:$0xff] %vm1070_vm15, %v1059_v43  ;;  %v2439_v43 = vld [vmem:[%s3568_s5] ss:$0 sm:$0xff] }
 0x2ab   :  { %v1061_v44 = vpop.permute.xlu1 %1060 }
 0x2ac   :  { %1072 = vst.msk [vmem:[#allocation2 + $0x8] sm:$0xff] %vm1070_vm15, %v1061_v44 }
 0x2ad   :  { %v1084_v45 = vpop.permute.xlu0 %1083 }
 0x2ae   :  { %1094 = vst.msk [vmem:[#allocation2 + $0x10] sm:$0xff] %vm1091_vm1, %v1084_v45 }
 0x2af   :  { %v1086_v46 = vpop.permute.xlu1 %1085 }
 0x2b0   :  { %1095 = vst.msk [vmem:[#allocation2 + $0x18] sm:$0xff] %vm1091_vm1, %v1086_v46 }
 0x2b1   :  { %v1080_v47 = vpop.permute.xlu0 %1079 }
 0x2b2   :  { %1092 = vst.msk [vmem:[#allocation2] sm:$0xff] %vm1091_vm1, %v1080_v47 }
 0x2b3   :  { %v1082_v48 = vpop.permute.xlu1 %1081 }
 0x2b4   :  { %1093 = vst.msk [vmem:[#allocation2 + $0x8] sm:$0xff] %vm1091_vm1, %v1082_v48  ;;  %vm1866_vm1 = vcmask 1043456  }
 0x2b5   :  { %v1101_v49 = vpop.permute.xlu0 %1100 }
 0x2b6   :  { %1113 = vst.msk [vmem:[#allocation2] sm:$0xff] %vm1112_vm3, %v1101_v49 }
 0x2b9   :  { %v1105_v50 = vpop.permute.xlu0 %1104  ;;  %v1103_v51 = vpop.permute.xlu1 %1102 }
 0x2ba   :  { %1115 = vst.msk [vmem:[#allocation2 + $0x10] sm:$0xff] %vm1112_vm3, %v1105_v50  ;;  %1114 = vst.msk [vmem:[#allocation2 + $0x8] sm:$0xff] %vm1112_vm3, %v1103_v51 }
 0x2bd   :  { %v1107_v52 = vpop.permute.xlu1 %1106  ;;  %v1117_v53 = vld [vmem:[#allocation2] sm:$0xff] }
 0x2be   :  { %1116 = vst.msk [vmem:[#allocation2 + $0x18] sm:$0xff] %vm1112_vm3, %v1107_v52  ;;  %vm1972_vm3 = vcmask 523520  }
 0x2c1   :  { %v1118_v54 = vld [vmem:[#allocation2 + $0x8] sm:$0xff]  ;;  %v1119_v56 = vld [vmem:[#allocation2 + $0x10] sm:$0xff] }
 0x2c2   :  { %v1121_v55 = vpack.c.bf16 %v1118_v54, %v1117_v53 }
 0x2c4   :  { %2781 = vmatprep.mubr.bf16.mxu0 %v1121_v55 }
 0x2c5   :  { %v1120_v57 = vld [vmem:[#allocation2 + $0x18] sm:$0xff] }
 0x2c6   :  { %v1122_v58 = vpack.c.bf16 %v1120_v57, %v1119_v56 }
 0x2c8   :  { %2782 = vmatmul.mubr.bf16.vlgmr.msra.gmra.mxu0 %v1122_v58 }
 0x2c9   :  { %2789 = vmatprep.mubr.msk.bf16.mxu0 %vm1371_vm4, %v2880_v59 }
 0x388   :  { %v2783_v60 = vpop.f32.mrf.mxu0 }
 0x389   :  { %v1241_v3 = vsel %vm74_vm0, %v2783_v60, 0.0 }
 0x38a   :  { %v1221_v61 = vpop.f32.mrf.mxu0 }
 0x38b   :  { %v1238_v0 = vsel %vm74_vm0, %v1221_v61, 0.0 }
 0x38c   :  { %v2784_v62 = vpop.f32.mrf.mxu0 }
 0x38d   :  { %v1243_v5 = vsel %vm74_vm0, %v2784_v62, 0.0 }
 0x38e   :  { %v1224_v63 = vpop.f32.mrf.mxu0 }
 0x38f   :  { %v1239_v1 = vsel %vm74_vm0, %v1224_v63, 0.0 }
 0x390   :  { %v1240_v2 = vadd.f32 %v1239_v1, %v1238_v0  ;;  %v2883_v0 = vld [vmem:[%s3566_s6 + $0x18] sm:$0xff]   ;;  %v2884_v1 = vld [vmem:[%s3566_s6 + $0x20] sm:$0xff]  }
 0x392   :  { %v1242_v4 = vadd.f32 %v1241_v3, %v1240_v2  ;;  %v2885_v2 = vld [vmem:[%s3566_s6 + $0x28] sm:$0xff]   ;;  %v2886_v3 = vld [vmem:[%s3566_s6 + $0x30] sm:$0xff]  }
 0x394   :  { %v1244_v6 = vadd.f32 %v1243_v5, %v1242_v4  ;;  %v2887_v4 = vld [vmem:[%s3566_s6 + $0x38] sm:$0xff]  }
 0x396   :  { %v1245_v7 = vrot.slane %v1244_v6, 4 }
 0x398   :  { %v1246_v8 = vadd.f32 %v1245_v7, %v1244_v6 }
 0x39a   :  { %v1247_v9 = vrot.slane %v1246_v8, 2 }
 0x39c   :  { %v1248_v10 = vadd.f32 %v1247_v9, %v1246_v8  ;;  %v2888_v8 = vld [vmem:[%s3569_s7 + $0x78] sm:$0xff]  }
 0x39e   :  { %v1249_v11 = vrot.slane %v1248_v10, 1 }
 0x3a0   :  { %v1250_v12 = vadd.f32 %v1249_v11, %v1248_v10  ;;  %v2889_v10 = vld [vmem:[%s3569_s7 + $0x38] sm:$0xff]  }
 0x3a2   :  { %v1252_v13 = vmul.f32 0.03125, %v1250_v12  ;;  %v2890_v12 = vld [vmem:[%s3569_s7 + $0x70] sm:$0xff]  }
 0x3a4   :  { %v1253_v14 = vsub.f32 %v1221_v61, %v1252_v13  ;;  %v1254_v15 = vsub.f32 %v1224_v63, %v1252_v13  ;;  %v1255_v16 = vsub.f32 %v2783_v60, %v1252_v13  ;;  %v1256_v17 = vsub.f32 %v2784_v62, %v1252_v13  ;;  %v2881_v62 = vld [vmem:[%s3566_s6 + $0x8] sm:$0xff]   ;;  %v2882_v63 = vld [vmem:[%s3566_s6 + $0x10] sm:$0xff]  }
 0x3a6   :  { %v1257_v18 = vmul.f32 %v1253_v14, %v1253_v14  ;;  %v1258_v19 = vmul.f32 %v1254_v15, %v1254_v15  ;;  %v1259_v20 = vmul.f32 %v1255_v16, %v1255_v16  ;;  %v1260_v21 = vmul.f32 %v1256_v17, %v1256_v17 }
 0x3a8   :  { %v1261_v22 = vsel %vm74_vm0, %v1257_v18, 0.0  ;;  %v1262_v23 = vsel %vm74_vm0, %v1258_v19, 0.0  ;;  %v1264_v25 = vsel %vm74_vm0, %v1259_v20, 0.0  ;;  %v1266_v27 = vsel %vm74_vm0, %v1260_v21, 0.0  ;;  %v2893_v18 = vld [vmem:[%s3569_s7 + $0x28] sm:$0xff]   ;;  %v2894_v19 = vld [vmem:[%s3569_s7 + $0x60] sm:$0xff]  }
 0x3a9   :  { %v1263_v24 = vadd.f32 %v1262_v23, %v1261_v22  ;;  %v2895_v22 = vld [vmem:[%s3569_s7 + $0x20] sm:$0xff]  }
 0x3ab   :  { %v1265_v26 = vadd.f32 %v1264_v25, %v1263_v24  ;;  %v2896_v24 = vld [vmem:[%s3569_s7 + $0x58] sm:$0xff]  }
 0x3ad   :  { %v1267_v28 = vadd.f32 %v1266_v27, %v1265_v26  ;;  %v2897_v26 = vld [vmem:[%s3569_s7 + $0x18] sm:$0xff]  }
 0x3af   :  { %v1268_v29 = vrot.slane %v1267_v28, 4 }
 0x3b1   :  { %v1269_v30 = vadd.f32 %v1268_v29, %v1267_v28  ;;  %v2898_v28 = vld [vmem:[%s3569_s7 + $0x50] sm:$0xff]  }
 0x3b2   :  { %v2899_v29 = vld [vmem:[%s3569_s7 + $0x10] sm:$0xff]  }
 0x3b3   :  { %v1270_v31 = vrot.slane %v1269_v30, 2 }
 0x3b5   :  { %v1271_v32 = vadd.f32 %v1270_v31, %v1269_v30  ;;  %v2900_v31 = vld [vmem:[%s3569_s7 + $0x48] sm:$0xff]  }
 0x3b7   :  { %v1272_v33 = vrot.slane %v1271_v32, 1 }
 0x3b9   :  { %v1273_v34 = vadd.f32 %v1272_v33, %v1271_v32  ;;  %v2901_v32 = vld [vmem:[%s3569_s7 + $0x8] sm:$0xff]   ;;  %v2902_v33 = vld [vmem:[%s3569_s7 + $0x40] sm:$0xff]  }
 0x3bb   :  { %v1274_v35 = vmul.f32 0.03125, %v1273_v34 }
 0x3bd   :  { %v1275_v36 = vadd.f32 1e-05, %v1274_v35  ;;  %v2903_v35 = vld [vmem:[%s3569_s7] sm:$0xff]  }
 0x3bf   :  { %2944 = vrsqrt.f32 %v1275_v36 }
 0x3cc   :  { %v2945_v37 = vpop.eup %2944 }
 0x3cd   :  { %v1278_v39 = vmul.f32 %v2945_v37, %v1254_v15  ;;  %v1279_v40 = vmul.f32 %v2945_v37, %v1255_v16  ;;  %v1280_v41 = vmul.f32 %v2945_v37, %v1256_v17  ;;  %v1277_v42 = vmul.f32 %v2945_v37, %v1253_v14  ;;  %v2891_v14 = vld [vmem:[%s3569_s7 + $0x30] sm:$0xff]   ;;  %v2892_v17 = vld [vmem:[%s3569_s7 + $0x68] sm:$0xff]  }
 0x3cf   :  { %v1288_v44 = vmul.f32 %v2438_v38, %v1278_v39  ;;  %v1289_v45 = vmul.f32 %v2438_v38, %v1279_v40  ;;  %v1290_v46 = vmul.f32 %v2438_v38, %v1280_v41  ;;  %v1287_v47 = vmul.f32 %v2438_v38, %v1277_v42 }
 0x3d1   :  { %v1298_v48 = vadd.f32 %v2439_v43, %v1288_v44  ;;  %v1299_v49 = vadd.f32 %v2439_v43, %v1289_v45  ;;  %v1300_v50 = vadd.f32 %v2439_v43, %v1290_v46  ;;  %v1297_v51 = vadd.f32 %v2439_v43, %v1287_v47 }
 0x3d3   :  { %vm1303_vm5 = vcmp.gt.f32.partialorder %v1299_v49, 0.0  ;;  %vm1304_vm6 = vcmp.gt.f32.partialorder %v1300_v50, 0.0  ;;  %v1307_v52 = vmul.f32 0.2, %v1299_v49  ;;  %v1308_v53 = vmul.f32 0.2, %v1300_v50 }
 0x3d4   :  { %vm1301_vm7 = vcmp.gt.f32.partialorder %v1297_v51, 0.0  ;;  %vm1302_vm8 = vcmp.gt.f32.partialorder %v1298_v48, 0.0  ;;  %v1305_v54 = vmul.f32 0.2, %v1297_v51  ;;  %v1306_v55 = vmul.f32 0.2, %v1298_v48 }
 0x3d5   :  { %v1311_v56 = vsel %vm1303_vm5, %v1299_v49, %v1307_v52  ;;  %v1312_v57 = vsel %vm1304_vm6, %v1300_v50, %v1308_v53  ;;  %vm1978_vm5 = vcmask 785920   ;;  %vm1984_vm6 = vcmask 1048320  }
 0x3d6   :  { %v1330_v58 = vpack.c.bf16 %v1312_v57, %v1311_v56  ;;  %v1309_v59 = vsel %vm1301_vm7, %v1297_v51, %v1305_v54  ;;  %v1310_v60 = vsel %vm1302_vm8, %v1298_v48, %v1306_v55  ;;  %v2904_v55 = vld [vmem:[%s3570_s10] sm:$0xff]  }
 0x3d7   :  { %v1329_v61 = vpack.c.bf16 %v1310_v60, %v1309_v59 }
 0x3d8   :  { %2785 = vmatprep.subr.bf16.mxu0 %v1330_v58 }
 0x3d9   :  { %2786 = vmatpush3.bf16.msra.mxu0 %v1330_v58 }
 0x3da   :  { %2787 = vmatprep.subr.bf16.mxu0 %v1329_v61 }
 0x3dd   :  { %2788 = vmatpush3.bf16.msra.mxu0 %v1329_v61 }
 0x3de   :  { %2592 = vmatprep.subr.bf16.mxu0 %v2888_v8 }
 0x3e0   :  { %2790 = vmatmul.mubr.msk.bf16.vlgmr.msra.gmra.mxu0 %vm1371_vm4, %v2881_v62 }
 0x3e1   :  { %2793 = vmatprep.mubr.msk.bf16.mxu0 %vm1371_vm4, %v2882_v63  ;;  %2593 = vmatpush3.bf16.msra.mxu0 %v2889_v10 }
 0x3e2   :  { %2594 = vmatprep.subr.bf16.mxu0 %v2890_v12 }
 0x3e5   :  { %2595 = vmatpush3.bf16.msra.mxu0 %v2891_v14 }
 0x3e6   :  { %2596 = vmatprep.subr.bf16.mxu0 %v2892_v17  ;;  %v2472_v17 = vld [vmem:[%s3571_s8] ss:$0 sm:$0xff] }
 0x3e8   :  { %2794 = vmatmul.mubr.msk.bf16.gmra.mxu0 %vm1371_vm4, %v2883_v0 }
 0x3e9   :  { %2797 = vmatprep.mubr.msk.bf16.mxu0 %vm1371_vm4, %v2884_v1  ;;  %2597 = vmatpush3.bf16.msra.mxu0 %v2893_v18 }
 0x3ea   :  { %2598 = vmatprep.subr.bf16.mxu0 %v2894_v19  ;;  %v2473_v19 = vld [vmem:[%s3572_s9] ss:$0 sm:$0xff] }
 0x3ed   :  { %2599 = vmatpush3.bf16.msra.mxu0 %v2895_v22 }
 0x3ee   :  { %2600 = vmatprep.subr.bf16.mxu0 %v2896_v24 }
 0x3f0   :  { %2798 = vmatmul.mubr.msk.bf16.gmra.mxu0 %vm1371_vm4, %v2885_v2 }
 0x3f1   :  { %2801 = vmatprep.mubr.msk.bf16.mxu0 %vm1371_vm4, %v2886_v3  ;;  %2601 = vmatpush3.bf16.msra.mxu0 %v2897_v26  ;;  %v2905_v26 = vld [vmem:[%s3570_s10 + $0x8] sm:$0xff]  }
 0x3f2   :  { %2602 = vmatprep.subr.bf16.mxu0 %v2898_v28  ;;  %v2907_v28 = vld [vmem:[%s3570_s10 + $0x18] sm:$0xff]  }
 0x3f5   :  { %2603 = vmatpush3.bf16.msra.mxu0 %v2899_v29  ;;  %v2908_v29 = vld [vmem:[%s3570_s10 + $0x20] sm:$0xff]  }
 0x3f6   :  { %2604 = vmatprep.subr.bf16.mxu0 %v2900_v31  ;;  %v2910_v31 = vld [vmem:[%s3570_s10 + $0x30] sm:$0xff]  }
 0x3f8   :  { %2802 = vmatmul.mubr.msk.bf16.gmra.mxu0 %vm1371_vm4, %v2887_v4 }
 0x3f9   :  { %2605 = vmatpush3.bf16.msra.mxu0 %v2901_v32  ;;  %v2911_v32 = vld [vmem:[%s3570_s10 + $0x38] sm:$0xff]  }
 0x3fa   :  { %2606 = vmatprep.subr.bf16.mxu0 %v2902_v33  ;;  %v2912_v33 = vld [vmem:[%s3573_s11 + $0x78] sm:$0xff]  }
 0x3fd   :  { %2607 = vmatpush3.bf16.msra.mxu0 %v2903_v35  ;;  %v2914_v35 = vld [vmem:[%s3573_s11 + $0x70] sm:$0xff]  }
 0x4a0   :  { %v2791_v5 = vpop.f32.mrf.mxu0 }
 0x4a1   :  { %1501 = vrot.lane.b32.xlu1 %v2791_v5, %s2955_s22 }
 0x4a2   :  { %v1430_v6 = vpop.f32.mrf.mxu0 }
 0x4a3   :  { %1493 = vst.msk [vmem:[#allocation3] sm:$0xff] %vm74_vm0, %v1430_v6 }
 0x4a4   :  { %v2792_v7 = vpop.f32.mrf.mxu0 }
 0x4a5   :  { %1507 = vrot.lane.b32.xlu1 %v2792_v7, %s2957_s24 }
 0x4a6   :  { %v1433_v9 = vpop.f32.mrf.mxu0 }
 0x4a8   :  { %v2795_v11 = vpop.f32.mrf.mxu0 }
 0x4a9   :  { %1495 = vrot.lane.b32.xlu1 %v1433_v9, %s2953_s2 }
 0x4aa   :  { %v1446_v13 = vpop.f32.mrf.mxu0 }
 0x4ac   :  { %v2796_v15 = vpop.f32.mrf.mxu0 }
 0x4ad   :  { %1525 = vrot.lane.b32.xlu1 %v2795_v11, %s2963_s15 }
 0x4ae   :  { %v1449_v16 = vpop.f32.mrf.mxu0 }
 0x4b0   :  { %v2799_v20 = vpop.f32.mrf.mxu0 }
 0x4b1   :  { %1513 = vrot.lane.b32.xlu1 %v1446_v13, %s2959_s26  ;;  %1543 = vrot.lane.b32.xlu0 %v2799_v20, %s2955_s22 }
 0x4b2   :  { %v1462_v21 = vpop.f32.mrf.mxu0 }
 0x4b3   :  { %1536 = vst.msk [vmem:[#allocation3 + $0x8] sm:$0xff] %vm74_vm0, %v1462_v21  ;;  %vm1498_vm0 = vcmask 261248  }
 0x4b4   :  { %v2800_v23 = vpop.f32.mrf.mxu0 }
 0x4b5   :  { %1519 = vrot.lane.b32.xlu1 %v1449_v16, %s2961_s28  ;;  %1548 = vrot.lane.b32.xlu0 %v2800_v23, %s2957_s24 }
 0x4b6   :  { %v1465_v25 = vpop.f32.mrf.mxu0 }
 0x4b8   :  { %v2803_v27 = vpop.f32.mrf.mxu0 }
 0x4b9   :  { %1531 = vrot.lane.b32.xlu1 %v2796_v15, %s2965_s27  ;;  %1538 = vrot.lane.b32.xlu0 %v1465_v25, %s2953_s2 }
 0x4ba   :  { %v1478_v30 = vpop.f32.mrf.mxu0 }
 0x4bc   :  { %v2804_v34 = vpop.f32.mrf.mxu0 }
 0x4bd   :  { %1563 = vrot.lane.b32.xlu0 %v2803_v27, %s2963_s15  ;;  %v2906_v27 = vld [vmem:[%s3570_s10 + $0x10] sm:$0xff]  }
 0x4be   :  { %v1481_v36 = vpop.f32.mrf.mxu0 }
 0x4c1   :  { %1553 = vrot.lane.b32.xlu0 %v1478_v30, %s2959_s26  ;;  %v2909_v30 = vld [vmem:[%s3570_s10 + $0x28] sm:$0xff]  }
 0x4c5   :  { %1558 = vrot.lane.b32.xlu0 %v1481_v36, %s2961_s28  ;;  %v2915_v36 = vld [vmem:[%s3573_s11 + $0x30] sm:$0xff]  }
 0x4c9   :  { %1568 = vrot.lane.b32.xlu0 %v2804_v34, %s2965_s27  ;;  %v2913_v34 = vld [vmem:[%s3573_s11 + $0x38] sm:$0xff]  }
 0x513   :  { %v1502_v37 = vpop.permute.xlu1 %1501 }
 0x517   :  { %v1508_v38 = vpop.permute.xlu1 %1507 }
 0x51b   :  { %v1496_v39 = vpop.permute.xlu1 %1495 }
 0x51c   :  { %1499 = vst.msk [vmem:[#allocation3] sm:$0xff] %vm1498_vm0, %v1496_v39  ;;  %v2918_v39 = vld [vmem:[%s3573_s11 + $0x60] sm:$0xff]  }
 0x51d   :  { %1505 = vst.msk [vmem:[#allocation3] sm:$0xff] %vm1504_vm9, %v1502_v37  ;;  %v2916_v37 = vld [vmem:[%s3573_s11 + $0x68] sm:$0xff]  }
 0x51e   :  { %1511 = vst.msk [vmem:[#allocation3] sm:$0xff] %vm1510_vm10, %v1508_v38  ;;  %v2917_v38 = vld [vmem:[%s3573_s11 + $0x28] sm:$0xff]  }
 0x51f   :  { %v1526_v40 = vpop.permute.xlu1 %1525 }
 0x523   :  { %v1514_v41 = vpop.permute.xlu1 %1513  ;;  %v1544_v42 = vpop.permute.xlu0 %1543 }
 0x524   :  { %1517 = vst.msk [vmem:[#allocation3] sm:$0xff] %vm1516_vm11, %v1514_v41  ;;  %v2920_v41 = vld [vmem:[%s3573_s11 + $0x58] sm:$0xff]  }
 0x527   :  { %v1520_v43 = vpop.permute.xlu1 %1519  ;;  %v1549_v44 = vpop.permute.xlu0 %1548 }
 0x528   :  { %1523 = vst.msk [vmem:[#allocation3] sm:$0xff] %vm1522_vm12, %v1520_v43 }
 0x529   :  { %1529 = vst.msk [vmem:[#allocation3] sm:$0xff] %vm1528_vm13, %v1526_v40  ;;  %v2919_v40 = vld [vmem:[%s3573_s11 + $0x20] sm:$0xff]  }
 0x52b   :  { %v1532_v45 = vpop.permute.xlu1 %1531  ;;  %v1539_v46 = vpop.permute.xlu0 %1538 }
 0x52c   :  { %1535 = vst.msk [vmem:[#allocation3] sm:$0xff] %vm1534_vm14, %v1532_v45  ;;  %v2922_v45 = vld [vmem:[%s3573_s11 + $0x50] sm:$0xff]  }
 0x52d   :  { %1541 = vst.msk [vmem:[#allocation3 + $0x8] sm:$0xff] %vm1498_vm0, %v1539_v46  ;;  %v2923_v46 = vld [vmem:[%s3573_s11 + $0x10] sm:$0xff]  }
 0x52e   :  { %1546 = vst.msk [vmem:[#allocation3 + $0x8] sm:$0xff] %vm1504_vm9, %v1544_v42  ;;  %v2921_v42 = vld [vmem:[%s3573_s11 + $0x18] sm:$0xff]  }
 0x52f   :  { %1551 = vst.msk [vmem:[#allocation3 + $0x8] sm:$0xff] %vm1510_vm10, %v1549_v44  ;;  %v1564_v47 = vpop.permute.xlu0 %1563 }
 0x533   :  { %v1554_v48 = vpop.permute.xlu0 %1553  ;;  %v1572_v51 = vld [vmem:[#allocation3] sm:$0xff] }
 0x534   :  { %1556 = vst.msk [vmem:[#allocation3 + $0x8] sm:$0xff] %vm1516_vm11, %v1554_v48  ;;  %v1574_v54 = vpack.c.bf16 %v1572_v51, %v1572_v51  ;;  %v2926_v51 = vld [vmem:[%s3573_s11 + $0x40] sm:$0xff]  }
 0x537   :  { %v1559_v49 = vpop.permute.xlu0 %1558 }
 0x538   :  { %1561 = vst.msk [vmem:[#allocation3 + $0x8] sm:$0xff] %vm1522_vm12, %v1559_v49  ;;  %v2924_v49 = vld [vmem:[%s3573_s11 + $0x48] sm:$0xff]  }
 0x539   :  { %1566 = vst.msk [vmem:[#allocation3 + $0x8] sm:$0xff] %vm1528_vm13, %v1564_v47 }
 0x53b   :  { %v1569_v50 = vpop.permute.xlu0 %1568 }
 0x53c   :  { %1571 = vst.msk [vmem:[#allocation3 + $0x8] sm:$0xff] %vm1534_vm14, %v1569_v50  ;;  %v2925_v50 = vld [vmem:[%s3573_s11 + $0x8] sm:$0xff]  }
 0x543   :  { %v1573_v52 = vld [vmem:[#allocation3 + $0x8] sm:$0xff] }
 0x544   :  { %v1575_v53 = vpack.c.bf16 %v1573_v52, %v1573_v52 }
 0x546   :  { %1736 = vmatprep.mubr.bf16.mxu0 %v1575_v53 }
 0x547   :  { %1737 = vmatmul.mubr.bf16.vlgmr.msra.gmra.mxu0 %v1574_v54  ;;  %v2927_v54 = vld [vmem:[%s3573_s11] sm:$0xff]  }
 0x548   :  { %2807 = vmatprep.mubr.msk.bf16.mxu0 %vm797_vm2, %v2904_v55 }
 0x607   :  { %v2608_v56 = vpop.f32.mrf.mxu0 }
 0x609   :  { %v2609_v57 = vpop.f32.mrf.mxu0 }
 0x60a   :  { %v2610_v58 = vadd.f32 %v2609_v57, %v2608_v56  ;;  %v2928_v57 = vld [vmem:[%s3573_s11 + $0xf8] sm:$0xff]  }
 0x60b   :  { %v2611_v59 = vpop.f32.mrf.mxu0 }
 0x60c   :  { %v1746_v60 = vsel %vm1371_vm4, %v2610_v58, 0.0 }
 0x60d   :  { %v1747_v61 = vrot.slane %v1746_v60, 4  ;;  %v2612_v62 = vpop.f32.mrf.mxu0 }
 0x60f   :  { %v1748_v63 = vadd.f32 %v1747_v61, %v1746_v60 }
 0x611   :  { %v1749_v0 = vrot.slane %v1748_v63, 2 }
 0x613   :  { %v1750_v1 = vadd.f32 %v1749_v0, %v1748_v63 }
 0x615   :  { %v1751_v2 = vrot.slane %v1750_v1, 1 }
 0x617   :  { %v1752_v3 = vadd.f32 %v1751_v2, %v1750_v1 }
 0x619   :  { %v1754_v4 = vmul.f32 0.125, %v1752_v3 }
 0x61b   :  { %v1755_v5 = vsub.f32 %v2610_v58, %v1754_v4 }
 0x61d   :  { %v1756_v6 = vmul.f32 %v1755_v5, %v1755_v5 }
 0x61f   :  { %v1757_v7 = vsel %vm1371_vm4, %v1756_v6, 0.0 }
 0x620   :  { %v1758_v8 = vrot.slane %v1757_v7, 4 }
 0x622   :  { %v1759_v9 = vadd.f32 %v1758_v8, %v1757_v7 }
 0x624   :  { %v1760_v10 = vrot.slane %v1759_v9, 2 }
 0x626   :  { %v1761_v11 = vadd.f32 %v1760_v10, %v1759_v9 }
 0x628   :  { %v1762_v12 = vrot.slane %v1761_v11, 1 }
 0x62a   :  { %v1763_v13 = vadd.f32 %v1762_v12, %v1761_v11 }
 0x62c   :  { %v1764_v14 = vmul.f32 0.125, %v1763_v13 }
 0x62e   :  { %v1765_v15 = vadd.f32 1e-05, %v1764_v14 }
 0x630   :  { %2946 = vrsqrt.f32 %v1765_v15  ;;  %v2929_v15 = vld [vmem:[%s3573_s11 + $0xb8] sm:$0xff]  }
 0x63d   :  { %v2947_v16 = vpop.eup %2946 }
 0x63e   :  { %v1767_v18 = vmul.f32 %v2947_v16, %v1755_v5 }
 0x640   :  { %v1774_v20 = vmul.f32 %v2472_v17, %v1767_v18  ;;  %v2930_v17 = vld [vmem:[%s3573_s11 + $0xf0] sm:$0xff]  }
 0x642   :  { %v1781_v21 = vadd.f32 %v2473_v19, %v1774_v20  ;;  %v2931_v19 = vld [vmem:[%s3573_s11 + $0xb0] sm:$0xff]   ;;  %v2932_v20 = vld [vmem:[%s3573_s11 + $0xe8] sm:$0xff]  }
 0x644   :  { %vm1782_vm15 = vcmp.gt.f32.partialorder %v1781_v21, 0.0  ;;  %v1783_v22 = vmul.f32 0.2, %v1781_v21 }
 0x646   :  { %v1784_v23 = vsel %vm1782_vm15, %v1781_v21, %v1783_v22  ;;  %v2933_v22 = vld [vmem:[%s3573_s11 + $0xa8] sm:$0xff]  }
 0x647   :  { %v1801_v24 = vpack.c.bf16 %v1784_v23, %v1784_v23  ;;  %v2934_v23 = vld [vmem:[%s3573_s11 + $0xe0] sm:$0xff]  }
 0x649   :  { %2823 = vmatprep.subr.msk.bf16.mxu0 %vm1866_vm1, %v1801_v24  ;;  %v1868_v25 = vsel %vm1866_vm1, %v1801_v24, 0  ;;  %v2935_v24 = vld [vmem:[%s3573_s11 + $0xa0] sm:$0xff]  }
 0x64a   :  { %2806 = vmatpush3.bf16.msra.mxu0 %v1868_v25  ;;  %v2936_v25 = vld [vmem:[%s3573_s11 + $0xd8] sm:$0xff]  }
 0x64b   :  { %2623 = vmatprep.subr.bf16.mxu0 %v2912_v33  ;;  %v2942_v33 = vld [vmem:[%s3573_s11 + $0xc0] sm:$0xff]  }
 0x64d   :  { %2808 = vmatmul.mubr.msk.bf16.vlgmr.msra.gmra.mxu0 %vm797_vm2, %v2905_v26 }
 0x64e   :  { %2811 = vmatprep.mubr.msk.bf16.mxu0 %vm797_vm2, %v2906_v27  ;;  %2624 = vmatpush3.bf16.msra.mxu0 %v2913_v34  ;;  %v2937_v27 = vld [vmem:[%s3573_s11 + $0x98] sm:$0xff]   ;;  %v2943_v34 = vld [vmem:[%s3573_s11 + $0x80] sm:$0xff]  }
 0x64f   :  { %2625 = vmatprep.subr.bf16.mxu0 %v2914_v35 }
 0x652   :  { %2626 = vmatpush3.bf16.msra.mxu0 %v2915_v36 }
 0x653   :  { %2627 = vmatprep.subr.bf16.mxu0 %v2916_v37 }
 0x655   :  { %2812 = vmatmul.mubr.msk.bf16.gmra.mxu0 %vm797_vm2, %v2907_v28 }
 0x656   :  { %2815 = vmatprep.mubr.msk.bf16.mxu0 %vm797_vm2, %v2908_v29  ;;  %2628 = vmatpush3.bf16.msra.mxu0 %v2917_v38  ;;  %v2938_v29 = vld [vmem:[%s3573_s11 + $0xd0] sm:$0xff]  }
 0x657   :  { %2629 = vmatprep.subr.bf16.mxu0 %v2918_v39 }
 0x65a   :  { %2630 = vmatpush3.bf16.msra.mxu0 %v2919_v40 }
 0x65b   :  { %2631 = vmatprep.subr.bf16.mxu0 %v2920_v41 }
 0x65d   :  { %2816 = vmatmul.mubr.msk.bf16.gmra.mxu0 %vm797_vm2, %v2909_v30  ;;  %v2939_v30 = vld [vmem:[%s3573_s11 + $0x90] sm:$0xff]  }
 0x65e   :  { %2819 = vmatprep.mubr.msk.bf16.mxu0 %vm797_vm2, %v2910_v31  ;;  %2632 = vmatpush3.bf16.msra.mxu0 %v2921_v42  ;;  %v2940_v31 = vld [vmem:[%s3573_s11 + $0xc8] sm:$0xff]  }
 0x65f   :  { %2633 = vmatprep.subr.bf16.mxu0 %v2922_v45 }
 0x662   :  { %2634 = vmatpush3.bf16.msra.mxu0 %v2923_v46 }
 0x663   :  { %2635 = vmatprep.subr.bf16.mxu0 %v2924_v49 }
 0x665   :  { %2820 = vmatmul.mubr.msk.bf16.gmra.mxu0 %vm797_vm2, %v2911_v32  ;;  %v2941_v32 = vld [vmem:[%s3573_s11 + $0x88] sm:$0xff]  }
 0x666   :  { %2636 = vmatpush3.bf16.msra.mxu0 %v2925_v50 }
 0x667   :  { %2637 = vmatprep.subr.bf16.mxu0 %v2926_v51 }
 0x66a   :  { %2638 = vmatpush3.bf16.msra.mxu0 %v2927_v54 }
 0x66b   :  { %2645 = vmatprep.subr.bf16.mxu0 %v2928_v57 }
 0x70d   :  { %v2809_v43 = vpop.f32.mrf.mxu0 }
 0x70e   :  { %1975 = vrot.lane.b32.xlu1 %v2809_v43, %s2959_s26 }
 0x70f   :  { %v1904_v44 = vpop.f32.mrf.mxu0 }
 0x710   :  { %1967 = vst.msk [vmem:[#allocation4] sm:$0xff] %vm1371_vm4, %v1904_v44 }
 0x711   :  { %v2810_v47 = vpop.f32.mrf.mxu0 }
 0x713   :  { %v1907_v48 = vpop.f32.mrf.mxu0 }
 0x714   :  { %1969 = vrot.lane.b32.xlu1 %v1907_v48, %s2955_s22 }
 0x715   :  { %v2813_v52 = vpop.f32.mrf.mxu0 }
 0x716   :  { %1993 = vrot.lane.b32.xlu0 %v2813_v52, %s2959_s26 }
 0x717   :  { %v1920_v53 = vpop.f32.mrf.mxu0 }
 0x718   :  { %1986 = vst.msk [vmem:[#allocation4 + $0x8] sm:$0xff] %vm1371_vm4, %v1920_v53  ;;  %1981 = vrot.lane.b32.xlu1 %v2810_v47, %s2963_s15 }
 0x719   :  { %v2814_v55 = vpop.f32.mrf.mxu0 }
 0x71b   :  { %v1923_v56 = vpop.f32.mrf.mxu0 }
 0x71c   :  { %1988 = vrot.lane.b32.xlu0 %v1923_v56, %s2955_s22 }
 0x71d   :  { %v2817_v58 = vpop.f32.mrf.mxu0 }
 0x71e   :  { %2009 = vrot.lane.b32.xlu1 %v2817_v58, %s2959_s26 }
 0x71f   :  { %v1936_v59 = vpop.f32.mrf.mxu0 }
 0x720   :  { %1998 = vrot.lane.b32.xlu0 %v2814_v55, %s2963_s15  ;;  %2002 = vst.msk [vmem:[#allocation4 + $0x10] sm:$0xff] %vm1371_vm4, %v1936_v59 }
 0x721   :  { %v2818_v60 = vpop.f32.mrf.mxu0 }
 0x723   :  { %v1939_v61 = vpop.f32.mrf.mxu0 }
 0x724   :  { %2004 = vrot.lane.b32.xlu1 %v1939_v61, %s2955_s22 }
 0x725   :  { %v2821_v62 = vpop.f32.mrf.mxu0 }
 0x726   :  { %2025 = vrot.lane.b32.xlu0 %v2821_v62, %s2959_s26 }
 0x727   :  { %v1952_v63 = vpop.f32.mrf.mxu0 }
 0x728   :  { %2018 = vst.msk [vmem:[#allocation4 + $0x18] sm:$0xff] %vm1371_vm4, %v1952_v63  ;;  %2014 = vrot.lane.b32.xlu1 %v2818_v60, %s2963_s15 }
 0x729   :  { %v2822_v0 = vpop.f32.mrf.mxu0 }
 0x72b   :  { %v1955_v1 = vpop.f32.mrf.mxu0 }
 0x72c   :  { %2020 = vrot.lane.b32.xlu0 %v1955_v1, %s2955_s22 }
 0x730   :  { %2030 = vrot.lane.b32.xlu0 %v2822_v0, %s2963_s15 }
 0x780   :  { %v1976_v2 = vpop.permute.xlu1 %1975 }
 0x786   :  { %v1970_v3 = vpop.permute.xlu1 %1969 }
 0x787   :  { %1973 = vst.msk [vmem:[#allocation4] sm:$0xff] %vm1972_vm3, %v1970_v3 }
 0x788   :  { %1979 = vst.msk [vmem:[#allocation4] sm:$0xff] %vm1978_vm5, %v1976_v2  ;;  %v1994_v5 = vpop.permute.xlu0 %1993 }
 0x78a   :  { %v1982_v4 = vpop.permute.xlu1 %1981 }
 0x78b   :  { %1985 = vst.msk [vmem:[#allocation4] sm:$0xff] %vm1984_vm6, %v1982_v4 }
 0x78e   :  { %v1989_v6 = vpop.permute.xlu0 %1988 }
 0x78f   :  { %1991 = vst.msk [vmem:[#allocation4 + $0x8] sm:$0xff] %vm1972_vm3, %v1989_v6 }
 0x790   :  { %1996 = vst.msk [vmem:[#allocation4 + $0x8] sm:$0xff] %vm1978_vm5, %v1994_v5  ;;  %v2010_v7 = vpop.permute.xlu1 %2009 }
 0x792   :  { %v1999_v8 = vpop.permute.xlu0 %1998  ;;  %v2034_v11 = vld [vmem:[#allocation4] sm:$0xff] }
 0x793   :  { %2001 = vst.msk [vmem:[#allocation4 + $0x8] sm:$0xff] %vm1984_vm6, %v1999_v8  ;;  %v2038_v16 = vpack.c.bf16 %v2034_v11, %v2034_v11 }
 0x796   :  { %v2005_v9 = vpop.permute.xlu1 %2004 }
 0x797   :  { %2007 = vst.msk [vmem:[#allocation4 + $0x10] sm:$0xff] %vm1972_vm3, %v2005_v9 }
 0x798   :  { %2012 = vst.msk [vmem:[#allocation4 + $0x10] sm:$0xff] %vm1978_vm5, %v2010_v7  ;;  %v2026_v10 = vpop.permute.xlu0 %2025 }
 0x79a   :  { %v2035_v12 = vld [vmem:[#allocation4 + $0x8] sm:$0xff]  ;;  %v2015_v13 = vpop.permute.xlu1 %2014 }
 0x79b   :  { %v2039_v14 = vpack.c.bf16 %v2035_v12, %v2035_v12  ;;  %2017 = vst.msk [vmem:[#allocation4 + $0x10] sm:$0xff] %vm1984_vm6, %v2015_v13 }
 0x79d   :  { %2330 = vmatprep.mubr.bf16.mxu0 %v2039_v14 }
 0x79e   :  { %2331 = vmatmul.mubr.bf16.vlgmr.msra.gmra.mxu0 %v2038_v16  ;;  %v2021_v18 = vpop.permute.xlu0 %2020 }
 0x79f   :  { %2646 = vmatpush3.bf16.msra.mxu0 %v2929_v15  ;;  %2023 = vst.msk [vmem:[#allocation4 + $0x18] sm:$0xff] %vm1972_vm3, %v2021_v18 }
 0x7a0   :  { %2647 = vmatprep.subr.bf16.mxu0 %v2930_v17  ;;  %2028 = vst.msk [vmem:[#allocation4 + $0x18] sm:$0xff] %vm1978_vm5, %v2026_v10 }
 0x7a2   :  { %v2031_v21 = vpop.permute.xlu0 %2030  ;;  %v2036_v35 = vld [vmem:[#allocation4 + $0x10] sm:$0xff] }
 0x7a3   :  { %2648 = vmatpush3.bf16.msra.mxu0 %v2931_v19  ;;  %2033 = vst.msk [vmem:[#allocation4 + $0x18] sm:$0xff] %vm1984_vm6, %v2031_v21  ;;  %v2040_v36 = vpack.c.bf16 %v2036_v35, %v2036_v35 }
 0x7a4   :  { %2649 = vmatprep.subr.bf16.mxu0 %v2932_v20 }
 0x7a7   :  { %2650 = vmatpush3.bf16.msra.mxu0 %v2933_v22 }
 0x7a8   :  { %2651 = vmatprep.subr.bf16.mxu0 %v2934_v23 }
 0x7aa   :  { %v2037_v26 = vld [vmem:[#allocation4 + $0x18] sm:$0xff] }
 0x7ab   :  { %2652 = vmatpush3.bf16.msra.mxu0 %v2935_v24  ;;  %v2041_v28 = vpack.c.bf16 %v2037_v26, %v2037_v26 }
 0x7ac   :  { %2653 = vmatprep.subr.bf16.mxu0 %v2936_v25 }
 0x7ad   :  { %2370 = vmatprep.mubr.bf16.mxu0 %v2041_v28 }
 0x7af   :  { %2654 = vmatpush3.bf16.msra.mxu0 %v2937_v27 }
 0x7b0   :  { %2655 = vmatprep.subr.bf16.mxu0 %v2938_v29 }
 0x7b3   :  { %2656 = vmatpush3.bf16.msra.mxu0 %v2939_v30 }
 0x7b4   :  { %2657 = vmatprep.subr.bf16.mxu0 %v2940_v31 }
 0x7b7   :  { %2658 = vmatpush3.bf16.msra.mxu0 %v2941_v32 }
 0x7b8   :  { %2659 = vmatprep.subr.bf16.mxu0 %v2942_v33 }
 0x7bb   :  { %2660 = vmatpush3.bf16.msra.mxu0 %v2943_v34 }
 0x7be   :  { %2371 = vmatmul.mubr.bf16.vlgmr.msra.gmra.mxu0 %v2040_v36 }
 0x85e   :  { %v2639_v37 = vpop.f32.mrf.mxu0 }
 0x860   :  { %v2640_v38 = vpop.f32.mrf.mxu0 }
 0x861   :  { %v2641_v43 = vadd.f32 %v2640_v38, %v2639_v37 }
 0x862   :  { %v2642_v39 = vpop.f32.mrf.mxu0 }
 0x864   :  { %v2643_v40 = vpop.f32.mrf.mxu0 }
 0x87e   :  { %v2661_v41 = vpop.f32.mrf.mxu0 }
 0x880   :  { %v2662_v42 = vpop.f32.mrf.mxu0 }
 0x881   :  { %v2663_v44 = vadd.f32 %v2662_v42, %v2661_v41 }
 0x882   :  { %v2664_v45 = vpop.f32.mrf.mxu0 }
 0x883   :  { %v2373_v46 = vadd.f32 %v2663_v44, %v2641_v43 }
 0x884   :  { %v2665_v47 = vpop.f32.mrf.mxu0 }
 0x885   :  { %v2522_v48 = vmul.f32 -1.442695, %v2373_v46 }
 0x887   :  { %2948 = vpow2.f32 %v2522_v48 }
 0x894   :  { %v2949_v49 = vpop.eup %2948 }
 0x895   :  { %v2381_v50 = vadd.f32 1.0, %v2949_v49 }
 0x897   :  { %2950 = vrcp.f32 %v2381_v50 }
 0x8a4   :  { %v2951_v51 = vpop.eup %2950 }
 0x8a5   :  { %2384 = vst.msk [vmem:[%s3574_s12] sm:$0xff] %vm797_vm2, %v2951_v51 }

</bundles_post_ra>
